<compile_context>
chip_gen: v5e
topology: v5e:2x2
jax: 0.10.0
libtpu: 0.0.40
codegen_flags: <defaults>
</compile_context>

<pallas_src>
import functools

import jax
import jax.numpy as jnp
from jax.experimental import pallas as pl
from jax.experimental.pallas import tpu as pltpu


def _cluster_kernel(x_ref, wih_ref, whh_ref, b_ref, wattn_ref,
                    wfc_ref, bfc_ref, rule_ref, out_ref, lstm_ref,
                    *, use_bf16_matmuls, approx_softmax_recip):
    x = x_ref[...].astype(jnp.float32)        # [S, TB, D]   (time-major)
    w_ih = wih_ref[...]                       # [D, 4H]
    w_hh = whh_ref[...]                       # [H, 4H]
    b = b_ref[...]                            # [1, 4H]  (b_ih + b_hh)
    w_attn = wattn_ref[...]                   # [H, H]
    w_fc = wfc_ref[...]                       # [H+R, Hp]   (Hp = lane-padded H)
    b_fc = bfc_ref[...]                       # [1, Hp]
    rules = rule_ref[...].astype(jnp.float32) # [TB, R]

    S, TB, D = x.shape
    H = w_hh.shape[0]
    mm_dtype = jnp.bfloat16 if use_bf16_matmuls else jnp.float32

    # ---- Hoisted input projection: one MXU call for every timestep, bias folded in.
    # Time-major rows => gates_in[t] is a contiguous [TB, 4H] slab.
    gates_in = jnp.dot(x.reshape(S * TB, D).astype(mm_dtype),
                       w_ih.astype(mm_dtype),
                       preferred_element_type=jnp.float32) + b         # [S*TB, 4H]
    gates_in = gates_in.reshape(S, TB, 4 * H)

    # ---- LSTM recurrence (PyTorch gate order i, f, g, o), statically unrolled.
    # Only h @ W_hh remains on the serial critical path (kept in f32); per-step h goes
    # straight into the time-major VMEM scratch with a contiguous store.
    h = jnp.zeros((TB, H), jnp.float32)
    c = jnp.zeros((TB, H), jnp.float32)
    for t in range(S):
        if t == 0:
            gates = gates_in[0]                # h == 0  =>  skip the h @ W_hh matmul
        else:
            gates = gates_in[t] + jnp.dot(h, w_hh,
                                          preferred_element_type=jnp.float32)
        # full-lane-width sigmoid over the whole [TB, 4H] gate vector (one EUP pass),
        # quarter-width tanh only for the g block.
        sig = jax.nn.sigmoid(gates)
        i_g = sig[:, 0:H]
        f_g = sig[:, H:2 * H]
        o_g = sig[:, 3 * H:4 * H]
        g_g = jnp.tanh(gates[:, 2 * H:3 * H])
        c = f_g * c + i_g * g_g
        h = o_g * jnp.tanh(c)
        lstm_ref[t] = h                        # contiguous [TB, H] store

    # one relayout after the loop: [S, TB, H] -> [TB, S, H] for batch-major attention
    lstm_out = jnp.transpose(lstm_ref[...], (1, 0, 2))

    # ---- Self attention (projection flattened to one matmul) ----
    proj = jnp.dot(lstm_out.reshape(TB * S, H).astype(mm_dtype),
                   w_attn.astype(mm_dtype),
                   preferred_element_type=jnp.float32).reshape(TB, S, H)
    scores = jnp.einsum('bsk,btk->bst', proj, lstm_out,
                        preferred_element_type=jnp.float32)             # [TB,S,S]
    scores = scores - jnp.max(scores, axis=-1, keepdims=True)
    p = jnp.exp(scores)
    p = p * pl.reciprocal(jnp.sum(p, axis=-1, keepdims=True),
                          approx=approx_softmax_recip)

    # ---- mean over sequence, folded into the attention contraction ----
    # mean_s(P @ lstm_out) == ((1/S) * sum_s P[:, s, :]) @ lstm_out
    w_pool = (jnp.sum(p, axis=1) * (1.0 / S))[:, None, :]               # [TB, 1, S]
    pooled = jnp.einsum('bqt,bth->bqh', w_pool, lstm_out,
                        preferred_element_type=jnp.float32)[:, 0, :]    # [TB, H]

    # ---- Linear on concat(pooled, rules) == split matmul (output lane-padded) ----
    w_fc_h = w_fc[:H, :]       # [H, Hp]
    w_fc_r = w_fc[H:, :]       # [R, Hp]
    out = (jnp.dot(pooled.astype(mm_dtype), w_fc_h.astype(mm_dtype),
                   preferred_element_type=jnp.float32)
           + jnp.dot(rules.astype(mm_dtype), w_fc_r.astype(mm_dtype),
                     preferred_element_type=jnp.float32)
           + b_fc)
    out_ref[...] = out.astype(out_ref.dtype)


def event_sequence_clustering_forward(event_sequences, time_features, rule_features,
                                      params, *, use_bf16_matmuls=False,
                                      approx_softmax_recip=False):
    # glue: embedding gather + feature concat stay in plain JAX
    emb = jnp.take(params["embedding"], event_sequences, axis=0)          # [B,S,E]
    x = jnp.concatenate([emb, time_features[..., None]], axis=-1)
    x = x.astype(jnp.float32)                                             # [B,S,E+1]

    B, S, D = x.shape
    H = params["w_hh_t"].shape[0]
    R = rule_features.shape[-1]

    b_lstm = (params["b_ih"] + params["b_hh"]).reshape(1, 4 * H)

    # lane-dense output: zero-pad fc output columns up to a multiple of 128
    H_pad = ((H + 127) // 128) * 128
    w_fc = params["w_fc_t"]
    b_fc = params["b_fc"].reshape(1, H)
    if H_pad != H:
        w_fc = jnp.pad(w_fc, ((0, 0), (0, H_pad - H)))
        b_fc = jnp.pad(b_fc, ((0, 0), (0, H_pad - H)))

    # Batch tiling: large tiles (up to 128 rows) so MXU rows / EUP lanes are filled;
    # zero-pad the batch to a multiple of the tile (padded rows are sliced off below).
    # Small batches -> one grid step; large batches -> several "parallel" steps (both
    # TensorCores on v7x).
    TB = min(((B + 7) // 8) * 8, 128)
    B_pad = ((B + TB - 1) // TB) * TB
    rules_in = rule_features.astype(jnp.float32)
    if B_pad != B:
        x = jnp.pad(x, ((0, B_pad - B), (0, 0), (0, 0)))
        rules_in = jnp.pad(rules_in, ((0, B_pad - B), (0, 0)))
    grid = (B_pad // TB,)

    # time-major input for the recurrence
    x_t = jnp.transpose(x, (1, 0, 2))                                     # [S, B_pad, D]

    kernel = functools.partial(_cluster_kernel,
                               use_bf16_matmuls=use_bf16_matmuls,
                               approx_softmax_recip=approx_softmax_recip)

    out = pl.pallas_call(
        kernel,
        out_shape=jax.ShapeDtypeStruct((B_pad, H_pad), jnp.float32),
        grid_spec=pltpu.PrefetchScalarGridSpec(
            num_scalar_prefetch=0,
            grid=grid,
            in_specs=[
                pl.BlockSpec((S, TB, D), lambda i: (0, i, 0)),    # x (time-major)
                pl.BlockSpec((D, 4 * H), lambda i: (0, 0)),       # W_ih^T
                pl.BlockSpec((H, 4 * H), lambda i: (0, 0)),       # W_hh^T
                pl.BlockSpec((1, 4 * H), lambda i: (0, 0)),       # b_ih + b_hh
                pl.BlockSpec((H, H), lambda i: (0, 0)),           # attention weights
                pl.BlockSpec((H + R, H_pad), lambda i: (0, 0)),   # W_fc^T (lane-padded)
                pl.BlockSpec((1, H_pad), lambda i: (0, 0)),       # b_fc   (lane-padded)
                pl.BlockSpec((TB, R), lambda i: (i, 0)),          # rule_features
            ],
            out_specs=pl.BlockSpec((TB, H_pad), lambda i: (i, 0)),
            scratch_shapes=[pltpu.VMEM((S, TB, H), jnp.float32)],  # time-major lstm states
        ),
        compiler_params=pltpu.CompilerParams(
            dimension_semantics=("parallel",)),
    )(x_t, params["w_ih_t"], params["w_hh_t"], b_lstm,
      params["w_attn"], w_fc, b_fc, rules_in)
    return out[:B, :H]


def _reference_forward(event_sequences, time_features, rule_features, params):
    # pure-JAX reference of the same forward pass (for correctness check)
    emb = jnp.take(params["embedding"], event_sequences, axis=0)
    x = jnp.concatenate([emb, time_features[..., None]], axis=-1).astype(jnp.float32)
    B, S, D = x.shape
    H = params["w_hh_t"].shape[0]
    b = (params["b_ih"] + params["b_hh"]).reshape(1, 4 * H)
    h = jnp.zeros((B, H), jnp.float32)
    c = jnp.zeros((B, H), jnp.float32)
    outs = []
    for t in range(S):
        gates = x[:, t] @ params["w_ih_t"] + h @ params["w_hh_t"] + b
        i_g = jax.nn.sigmoid(gates[:, :H])
        f_g = jax.nn.sigmoid(gates[:, H:2 * H])
        g_g = jnp.tanh(gates[:, 2 * H:3 * H])
        o_g = jax.nn.sigmoid(gates[:, 3 * H:])
        c = f_g * c + i_g * g_g
        h = o_g * jnp.tanh(c)
        outs.append(h)
    lstm_out = jnp.stack(outs, axis=1)
    scores = jnp.einsum('bsh,hk->bsk', lstm_out, params["w_attn"])
    scores = jnp.einsum('bsk,btk->bst', scores, lstm_out)
    p = jax.nn.softmax(scores, axis=-1)
    attn = jnp.einsum('bst,bth->bsh', p, lstm_out)
    pooled = attn.mean(axis=1)
    combined = jnp.concatenate([pooled, rule_features.astype(jnp.float32)], axis=-1)
    return combined @ params["w_fc_t"] + params["b_fc"].reshape(1, H)


if __name__ == "__main__":
    # Model hyperparameters (small, consistent with module signature)
    num_event_types = 10
    num_rules = 4
    embedding_dim = 16
    hidden_dim = 32
    num_clusters = 3          # cluster_center unused in forward
    B, S = 2, 8
    D = embedding_dim + 1
    H = hidden_dim

    key = jax.random.PRNGKey(0)
    keys = jax.random.split(key, 12)

    k_lstm = 1.0 / jnp.sqrt(H)
    params = {
        # nn.Embedding: N(0, 1)
        "embedding": jax.random.normal(keys[0], (num_event_types, embedding_dim), jnp.float32),
        # nn.LSTM weights, pre-transposed to [in, 4H] / [H, 4H]
        "w_ih_t": jax.random.uniform(keys[1], (D, 4 * H), jnp.float32, -k_lstm, k_lstm),
        "w_hh_t": jax.random.uniform(keys[2], (H, 4 * H), jnp.float32, -k_lstm, k_lstm),
        "b_ih": jax.random.uniform(keys[3], (4 * H,), jnp.float32, -k_lstm, k_lstm),
        "b_hh": jax.random.uniform(keys[4], (4 * H,), jnp.float32, -k_lstm, k_lstm),
        # SelfAttention: randn(H, H) (scaled mildly for tame softmax numerics)
        "w_attn": 0.2 * jax.random.normal(keys[5], (H, H), jnp.float32),
        # nn.Linear(H + R, H), pre-transposed to [H+R, H]
        "w_fc_t": jax.random.uniform(keys[6], (H + num_rules, H), jnp.float32,
                                     -1.0 / jnp.sqrt(H + num_rules), 1.0 / jnp.sqrt(H + num_rules)),
        "b_fc": jax.random.uniform(keys[7], (H,), jnp.float32,
                                   -1.0 / jnp.sqrt(H + num_rules), 1.0 / jnp.sqrt(H + num_rules)),
    }

    event_sequences = jax.random.randint(keys[8], (B, S), 0, num_event_types, jnp.int32)
    time_features = jax.random.uniform(keys[9], (B, S), jnp.float32)
    rule_features = jax.random.normal(keys[10], (B, num_rules), jnp.float32)

    out = event_sequence_clustering_forward(event_sequences, time_features, rule_features, params)
    out = jax.block_until_ready(out)

    ref = _reference_forward(event_sequences, time_features, rule_features, params)
    ref = jax.block_until_ready(ref)

    assert out.shape == (B, H), f"bad output shape {out.shape}"
    assert jnp.allclose(out, ref, atol=1e-4, rtol=1e-4), "kernel mismatch vs reference"

    print("KERNEL_OK")
</pallas_src>

<mosaic_0001>
module attributes {stable_mosaic.version = 11 : i64} {
  func.func @_cluster_kernel(%arg0: i32, %arg1: memref<8x8x17xf32, #tpu.memory_space<vmem>>, %arg2: memref<17x128xf32, #tpu.memory_space<vmem>>, %arg3: memref<32x128xf32, #tpu.memory_space<vmem>>, %arg4: memref<1x128xf32, #tpu.memory_space<vmem>>, %arg5: memref<32x32xf32, #tpu.memory_space<vmem>>, %arg6: memref<36x128xf32, #tpu.memory_space<vmem>>, %arg7: memref<1x128xf32, #tpu.memory_space<vmem>>, %arg8: memref<8x4xf32, #tpu.memory_space<vmem>>, %arg9: memref<8x128xf32, #tpu.memory_space<vmem>>, %arg10: memref<8x8x32xf32, #tpu.memory_space<vmem>>) attributes {dimension_semantics = [#tpu.dimension_semantics<parallel>], iteration_bounds = array<i64: 1>, scalar_prefetch = 0 : i64, scratch_operands = 1 : i64, tpu.core_type = #tpu.core_type<tc>, window_params = [{transform_indices = @transform_0, window_bounds = array<i64: 8, 8, 17>}, {pipeline_mode = #tpu.pipeline_mode<synchronous>, transform_indices = @transform_1, window_bounds = array<i64: 17, 128>}, {pipeline_mode = #tpu.pipeline_mode<synchronous>, transform_indices = @transform_2, window_bounds = array<i64: 32, 128>}, {pipeline_mode = #tpu.pipeline_mode<synchronous>, transform_indices = @transform_3, window_bounds = array<i64: 1, 128>}, {pipeline_mode = #tpu.pipeline_mode<synchronous>, transform_indices = @transform_4, window_bounds = array<i64: 32, 32>}, {pipeline_mode = #tpu.pipeline_mode<synchronous>, transform_indices = @transform_5, window_bounds = array<i64: 36, 128>}, {pipeline_mode = #tpu.pipeline_mode<synchronous>, transform_indices = @transform_6, window_bounds = array<i64: 1, 128>}, {transform_indices = @transform_7, window_bounds = array<i64: 8, 4>}, {transform_indices = @transform_8, window_bounds = array<i64: 8, 128>}]} {
    %c0 = arith.constant 0 : index
    %c0_0 = arith.constant 0 : index
    %c0_1 = arith.constant 0 : index
    %0 = vector.load %arg1[%c0, %c0_0, %c0_1] : memref<8x8x17xf32, #tpu.memory_space<vmem>>, vector<8x8x17xf32>
    %c0_2 = arith.constant 0 : index
    %c0_3 = arith.constant 0 : index
    %1 = vector.load %arg2[%c0_2, %c0_3] : memref<17x128xf32, #tpu.memory_space<vmem>>, vector<17x128xf32>
    %c0_4 = arith.constant 0 : index
    %c0_5 = arith.constant 0 : index
    %2 = vector.load %arg3[%c0_4, %c0_5] : memref<32x128xf32, #tpu.memory_space<vmem>>, vector<32x128xf32>
    %c0_6 = arith.constant 0 : index
    %c0_7 = arith.constant 0 : index
    %3 = vector.load %arg4[%c0_6, %c0_7] : memref<1x128xf32, #tpu.memory_space<vmem>>, vector<1x128xf32>
    %c0_8 = arith.constant 0 : index
    %c0_9 = arith.constant 0 : index
    %4 = vector.load %arg5[%c0_8, %c0_9] : memref<32x32xf32, #tpu.memory_space<vmem>>, vector<32x32xf32>
    %c0_10 = arith.constant 0 : index
    %c0_11 = arith.constant 0 : index
    %5 = vector.load %arg6[%c0_10, %c0_11] : memref<36x128xf32, #tpu.memory_space<vmem>>, vector<36x128xf32>
    %c0_12 = arith.constant 0 : index
    %c0_13 = arith.constant 0 : index
    %6 = vector.load %arg7[%c0_12, %c0_13] : memref<1x128xf32, #tpu.memory_space<vmem>>, vector<1x128xf32>
    %c0_14 = arith.constant 0 : index
    %c0_15 = arith.constant 0 : index
    %7 = vector.load %arg8[%c0_14, %c0_15] : memref<8x4xf32, #tpu.memory_space<vmem>>, vector<8x4xf32>
    %8 = vector.shape_cast %0 : vector<8x8x17xf32> to vector<64x17xf32>
    %cst = arith.constant dense<0.000000e+00> : vector<64x128xf32>
    %9 = tpu.matmul %8, %1, %cst {dimension_numbers = #tpu.dot_dimension_numbers<[1], [0], [0], [1], [0, 0, 1, 1], [], []>} : vector<64x17xf32>, vector<17x128xf32>, vector<64x128xf32> -> vector<64x128xf32>
    %10 = vector.broadcast %3 : vector<1x128xf32> to vector<64x128xf32>
    %11 = arith.addf %9, %10 : vector<64x128xf32>
    %12 = vector.shape_cast %11 : vector<64x128xf32> to vector<8x8x128xf32>
    %cst_16 = arith.constant 0.000000e+00 : f32
    %13 = vector.broadcast %cst_16 : f32 to vector<8x32xf32>
    %14 = vector.extract_strided_slice %12 {offsets = [0, 0, 0], sizes = [1, 8, 128], strides = [1, 1, 1]} : vector<8x8x128xf32> to vector<1x8x128xf32>
    %15 = vector.shape_cast %14 : vector<1x8x128xf32> to vector<8x128xf32>
    %16 = arith.negf %15 : vector<8x128xf32>
    %17 = math.exp %16 : vector<8x128xf32>
    %cst_17 = arith.constant 1.000000e+00 : f32
    %18 = vector.broadcast %cst_17 : f32 to vector<8x128xf32>
    %19 = arith.addf %18, %17 : vector<8x128xf32>
    %20 = arith.divf %18, %19 : vector<8x128xf32>
    %21 = vector.extract_strided_slice %20 {offsets = [0, 0], sizes = [8, 32], strides = [1, 1]} : vector<8x128xf32> to vector<8x32xf32>
    %22 = vector.extract_strided_slice %20 {offsets = [0, 32], sizes = [8, 32], strides = [1, 1]} : vector<8x128xf32> to vector<8x32xf32>
    %23 = vector.extract_strided_slice %20 {offsets = [0, 96], sizes = [8, 32], strides = [1, 1]} : vector<8x128xf32> to vector<8x32xf32>
    %24 = vector.extract_strided_slice %15 {offsets = [0, 64], sizes = [8, 32], strides = [1, 1]} : vector<8x128xf32> to vector<8x32xf32>
    %25 = math.tanh %24 : vector<8x32xf32>
    %26 = arith.mulf %22, %13 : vector<8x32xf32>
    %27 = arith.mulf %21, %25 : vector<8x32xf32>
    %28 = arith.addf %26, %27 : vector<8x32xf32>
    %29 = math.tanh %28 : vector<8x32xf32>
    %30 = arith.mulf %23, %29 : vector<8x32xf32>
    %c0_18 = arith.constant 0 : index
    %c0_19 = arith.constant 0 : index
    %c0_20 = arith.constant 0 : index
    %31 = vector.load %arg10[%c0_18, %c0_19, %c0_20] : memref<8x8x32xf32, #tpu.memory_space<vmem>>, vector<1x8x32xf32>
    %32 = vector.shape_cast %31 : vector<1x8x32xf32> to vector<8x32xf32>
    %33 = vector.shape_cast %30 : vector<8x32xf32> to vector<1x8x32xf32>
    tpu.vector_store %arg10[%c0_18, %c0_19, %c0_20], %33 {strides = array<i32>} : memref<8x8x32xf32, #tpu.memory_space<vmem>>, vector<1x8x32xf32>,
    %34 = vector.extract_strided_slice %12 {offsets = [1, 0, 0], sizes = [1, 8, 128], strides = [1, 1, 1]} : vector<8x8x128xf32> to vector<1x8x128xf32>
    %35 = vector.shape_cast %34 : vector<1x8x128xf32> to vector<8x128xf32>
    %cst_21 = arith.constant dense<0.000000e+00> : vector<8x128xf32>
    %36 = tpu.matmul %30, %2, %cst_21 {dimension_numbers = #tpu.dot_dimension_numbers<[1], [0], [0], [1], [0, 0, 1, 1], [], []>} : vector<8x32xf32>, vector<32x128xf32>, vector<8x128xf32> -> vector<8x128xf32>
    %37 = arith.addf %35, %36 : vector<8x128xf32>
    %38 = arith.negf %37 : vector<8x128xf32>
    %39 = math.exp %38 : vector<8x128xf32>
    %cst_22 = arith.constant 1.000000e+00 : f32
    %40 = vector.broadcast %cst_22 : f32 to vector<8x128xf32>
    %41 = arith.addf %40, %39 : vector<8x128xf32>
    %42 = arith.divf %40, %41 : vector<8x128xf32>
    %43 = vector.extract_strided_slice %42 {offsets = [0, 0], sizes = [8, 32], strides = [1, 1]} : vector<8x128xf32> to vector<8x32xf32>
    %44 = vector.extract_strided_slice %42 {offsets = [0, 32], sizes = [8, 32], strides = [1, 1]} : vector<8x128xf32> to vector<8x32xf32>
    %45 = vector.extract_strided_slice %42 {offsets = [0, 96], sizes = [8, 32], strides = [1, 1]} : vector<8x128xf32> to vector<8x32xf32>
    %46 = vector.extract_strided_slice %37 {offsets = [0, 64], sizes = [8, 32], strides = [1, 1]} : vector<8x128xf32> to vector<8x32xf32>
    %47 = math.tanh %46 : vector<8x32xf32>
    %48 = arith.mulf %44, %28 : vector<8x32xf32>
    %49 = arith.mulf %43, %47 : vector<8x32xf32>
    %50 = arith.addf %48, %49 : vector<8x32xf32>
    %51 = math.tanh %50 : vector<8x32xf32>
    %52 = arith.mulf %45, %51 : vector<8x32xf32>
    %c1 = arith.constant 1 : index
    %c0_23 = arith.constant 0 : index
    %c0_24 = arith.constant 0 : index
    %53 = vector.load %arg10[%c1, %c0_23, %c0_24] : memref<8x8x32xf32, #tpu.memory_space<vmem>>, vector<1x8x32xf32>
    %54 = vector.shape_cast %53 : vector<1x8x32xf32> to vector<8x32xf32>
    %55 = vector.shape_cast %52 : vector<8x32xf32> to vector<1x8x32xf32>
    tpu.vector_store %arg10[%c1, %c0_23, %c0_24], %55 {strides = array<i32>} : memref<8x8x32xf32, #tpu.memory_space<vmem>>, vector<1x8x32xf32>,
    %56 = vector.extract_strided_slice %12 {offsets = [2, 0, 0], sizes = [1, 8, 128], strides = [1, 1, 1]} : vector<8x8x128xf32> to vector<1x8x128xf32>
    %57 = vector.shape_cast %56 : vector<1x8x128xf32> to vector<8x128xf32>
    %cst_25 = arith.constant dense<0.000000e+00> : vector<8x128xf32>
    %58 = tpu.matmul %52, %2, %cst_25 {dimension_numbers = #tpu.dot_dimension_numbers<[1], [0], [0], [1], [0, 0, 1, 1], [], []>} : vector<8x32xf32>, vector<32x128xf32>, vector<8x128xf32> -> vector<8x128xf32>
    %59 = arith.addf %57, %58 : vector<8x128xf32>
    %60 = arith.negf %59 : vector<8x128xf32>
    %61 = math.exp %60 : vector<8x128xf32>
    %cst_26 = arith.constant 1.000000e+00 : f32
    %62 = vector.broadcast %cst_26 : f32 to vector<8x128xf32>
    %63 = arith.addf %62, %61 : vector<8x128xf32>
    %64 = arith.divf %62, %63 : vector<8x128xf32>
    %65 = vector.extract_strided_slice %64 {offsets = [0, 0], sizes = [8, 32], strides = [1, 1]} : vector<8x128xf32> to vector<8x32xf32>
    %66 = vector.extract_strided_slice %64 {offsets = [0, 32], sizes = [8, 32], strides = [1, 1]} : vector<8x128xf32> to vector<8x32xf32>
    %67 = vector.extract_strided_slice %64 {offsets = [0, 96], sizes = [8, 32], strides = [1, 1]} : vector<8x128xf32> to vector<8x32xf32>
    %68 = vector.extract_strided_slice %59 {offsets = [0, 64], sizes = [8, 32], strides = [1, 1]} : vector<8x128xf32> to vector<8x32xf32>
    %69 = math.tanh %68 : vector<8x32xf32>
    %70 = arith.mulf %66, %50 : vector<8x32xf32>
    %71 = arith.mulf %65, %69 : vector<8x32xf32>
    %72 = arith.addf %70, %71 : vector<8x32xf32>
    %73 = math.tanh %72 : vector<8x32xf32>
    %74 = arith.mulf %67, %73 : vector<8x32xf32>
    %c2 = arith.constant 2 : index
    %c0_27 = arith.constant 0 : index
    %c0_28 = arith.constant 0 : index
    %75 = vector.load %arg10[%c2, %c0_27, %c0_28] : memref<8x8x32xf32, #tpu.memory_space<vmem>>, vector<1x8x32xf32>
    %76 = vector.shape_cast %75 : vector<1x8x32xf32> to vector<8x32xf32>
    %77 = vector.shape_cast %74 : vector<8x32xf32> to vector<1x8x32xf32>
    tpu.vector_store %arg10[%c2, %c0_27, %c0_28], %77 {strides = array<i32>} : memref<8x8x32xf32, #tpu.memory_space<vmem>>, vector<1x8x32xf32>,
    %78 = vector.extract_strided_slice %12 {offsets = [3, 0, 0], sizes = [1, 8, 128], strides = [1, 1, 1]} : vector<8x8x128xf32> to vector<1x8x128xf32>
    %79 = vector.shape_cast %78 : vector<1x8x128xf32> to vector<8x128xf32>
    %cst_29 = arith.constant dense<0.000000e+00> : vector<8x128xf32>
    %80 = tpu.matmul %74, %2, %cst_29 {dimension_numbers = #tpu.dot_dimension_numbers<[1], [0], [0], [1], [0, 0, 1, 1], [], []>} : vector<8x32xf32>, vector<32x128xf32>, vector<8x128xf32> -> vector<8x128xf32>
    %81 = arith.addf %79, %80 : vector<8x128xf32>
    %82 = arith.negf %81 : vector<8x128xf32>
    %83 = math.exp %82 : vector<8x128xf32>
    %cst_30 = arith.constant 1.000000e+00 : f32
    %84 = vector.broadcast %cst_30 : f32 to vector<8x128xf32>
    %85 = arith.addf %84, %83 : vector<8x128xf32>
    %86 = arith.divf %84, %85 : vector<8x128xf32>
    %87 = vector.extract_strided_slice %86 {offsets = [0, 0], sizes = [8, 32], strides = [1, 1]} : vector<8x128xf32> to vector<8x32xf32>
    %88 = vector.extract_strided_slice %86 {offsets = [0, 32], sizes = [8, 32], strides = [1, 1]} : vector<8x128xf32> to vector<8x32xf32>
    %89 = vector.extract_strided_slice %86 {offsets = [0, 96], sizes = [8, 32], strides = [1, 1]} : vector<8x128xf32> to vector<8x32xf32>
    %90 = vector.extract_strided_slice %81 {offsets = [0, 64], sizes = [8, 32], strides = [1, 1]} : vector<8x128xf32> to vector<8x32xf32>
    %91 = math.tanh %90 : vector<8x32xf32>
    %92 = arith.mulf %88, %72 : vector<8x32xf32>
    %93 = arith.mulf %87, %91 : vector<8x32xf32>
    %94 = arith.addf %92, %93 : vector<8x32xf32>
    %95 = math.tanh %94 : vector<8x32xf32>
    %96 = arith.mulf %89, %95 : vector<8x32xf32>
    %c3 = arith.constant 3 : index
    %c0_31 = arith.constant 0 : index
    %c0_32 = arith.constant 0 : index
    %97 = vector.load %arg10[%c3, %c0_31, %c0_32] : memref<8x8x32xf32, #tpu.memory_space<vmem>>, vector<1x8x32xf32>
    %98 = vector.shape_cast %97 : vector<1x8x32xf32> to vector<8x32xf32>
    %99 = vector.shape_cast %96 : vector<8x32xf32> to vector<1x8x32xf32>
    tpu.vector_store %arg10[%c3, %c0_31, %c0_32], %99 {strides = array<i32>} : memref<8x8x32xf32, #tpu.memory_space<vmem>>, vector<1x8x32xf32>,
    %100 = vector.extract_strided_slice %12 {offsets = [4, 0, 0], sizes = [1, 8, 128], strides = [1, 1, 1]} : vector<8x8x128xf32> to vector<1x8x128xf32>
    %101 = vector.shape_cast %100 : vector<1x8x128xf32> to vector<8x128xf32>
    %cst_33 = arith.constant dense<0.000000e+00> : vector<8x128xf32>
    %102 = tpu.matmul %96, %2, %cst_33 {dimension_numbers = #tpu.dot_dimension_numbers<[1], [0], [0], [1], [0, 0, 1, 1], [], []>} : vector<8x32xf32>, vector<32x128xf32>, vector<8x128xf32> -> vector<8x128xf32>
    %103 = arith.addf %101, %102 : vector<8x128xf32>
    %104 = arith.negf %103 : vector<8x128xf32>
    %105 = math.exp %104 : vector<8x128xf32>
    %cst_34 = arith.constant 1.000000e+00 : f32
    %106 = vector.broadcast %cst_34 : f32 to vector<8x128xf32>
    %107 = arith.addf %106, %105 : vector<8x128xf32>
    %108 = arith.divf %106, %107 : vector<8x128xf32>
    %109 = vector.extract_strided_slice %108 {offsets = [0, 0], sizes = [8, 32], strides = [1, 1]} : vector<8x128xf32> to vector<8x32xf32>
    %110 = vector.extract_strided_slice %108 {offsets = [0, 32], sizes = [8, 32], strides = [1, 1]} : vector<8x128xf32> to vector<8x32xf32>
    %111 = vector.extract_strided_slice %108 {offsets = [0, 96], sizes = [8, 32], strides = [1, 1]} : vector<8x128xf32> to vector<8x32xf32>
    %112 = vector.extract_strided_slice %103 {offsets = [0, 64], sizes = [8, 32], strides = [1, 1]} : vector<8x128xf32> to vector<8x32xf32>
    %113 = math.tanh %112 : vector<8x32xf32>
    %114 = arith.mulf %110, %94 : vector<8x32xf32>
    %115 = arith.mulf %109, %113 : vector<8x32xf32>
    %116 = arith.addf %114, %115 : vector<8x32xf32>
    %117 = math.tanh %116 : vector<8x32xf32>
    %118 = arith.mulf %111, %117 : vector<8x32xf32>
    %c4 = arith.constant 4 : index
    %c0_35 = arith.constant 0 : index
    %c0_36 = arith.constant 0 : index
    %119 = vector.load %arg10[%c4, %c0_35, %c0_36] : memref<8x8x32xf32, #tpu.memory_space<vmem>>, vector<1x8x32xf32>
    %120 = vector.shape_cast %119 : vector<1x8x32xf32> to vector<8x32xf32>
    %121 = vector.shape_cast %118 : vector<8x32xf32> to vector<1x8x32xf32>
    tpu.vector_store %arg10[%c4, %c0_35, %c0_36], %121 {strides = array<i32>} : memref<8x8x32xf32, #tpu.memory_space<vmem>>, vector<1x8x32xf32>,
    %122 = vector.extract_strided_slice %12 {offsets = [5, 0, 0], sizes = [1, 8, 128], strides = [1, 1, 1]} : vector<8x8x128xf32> to vector<1x8x128xf32>
    %123 = vector.shape_cast %122 : vector<1x8x128xf32> to vector<8x128xf32>
    %cst_37 = arith.constant dense<0.000000e+00> : vector<8x128xf32>
    %124 = tpu.matmul %118, %2, %cst_37 {dimension_numbers = #tpu.dot_dimension_numbers<[1], [0], [0], [1], [0, 0, 1, 1], [], []>} : vector<8x32xf32>, vector<32x128xf32>, vector<8x128xf32> -> vector<8x128xf32>
    %125 = arith.addf %123, %124 : vector<8x128xf32>
    %126 = arith.negf %125 : vector<8x128xf32>
    %127 = math.exp %126 : vector<8x128xf32>
    %cst_38 = arith.constant 1.000000e+00 : f32
    %128 = vector.broadcast %cst_38 : f32 to vector<8x128xf32>
    %129 = arith.addf %128, %127 : vector<8x128xf32>
    %130 = arith.divf %128, %129 : vector<8x128xf32>
    %131 = vector.extract_strided_slice %130 {offsets = [0, 0], sizes = [8, 32], strides = [1, 1]} : vector<8x128xf32> to vector<8x32xf32>
    %132 = vector.extract_strided_slice %130 {offsets = [0, 32], sizes = [8, 32], strides = [1, 1]} : vector<8x128xf32> to vector<8x32xf32>
    %133 = vector.extract_strided_slice %130 {offsets = [0, 96], sizes = [8, 32], strides = [1, 1]} : vector<8x128xf32> to vector<8x32xf32>
    %134 = vector.extract_strided_slice %125 {offsets = [0, 64], sizes = [8, 32], strides = [1, 1]} : vector<8x128xf32> to vector<8x32xf32>
    %135 = math.tanh %134 : vector<8x32xf32>
    %136 = arith.mulf %132, %116 : vector<8x32xf32>
    %137 = arith.mulf %131, %135 : vector<8x32xf32>
    %138 = arith.addf %136, %137 : vector<8x32xf32>
    %139 = math.tanh %138 : vector<8x32xf32>
    %140 = arith.mulf %133, %139 : vector<8x32xf32>
    %c5 = arith.constant 5 : index
    %c0_39 = arith.constant 0 : index
    %c0_40 = arith.constant 0 : index
    %141 = vector.load %arg10[%c5, %c0_39, %c0_40] : memref<8x8x32xf32, #tpu.memory_space<vmem>>, vector<1x8x32xf32>
    %142 = vector.shape_cast %141 : vector<1x8x32xf32> to vector<8x32xf32>
    %143 = vector.shape_cast %140 : vector<8x32xf32> to vector<1x8x32xf32>
    tpu.vector_store %arg10[%c5, %c0_39, %c0_40], %143 {strides = array<i32>} : memref<8x8x32xf32, #tpu.memory_space<vmem>>, vector<1x8x32xf32>,
    %144 = vector.extract_strided_slice %12 {offsets = [6, 0, 0], sizes = [1, 8, 128], strides = [1, 1, 1]} : vector<8x8x128xf32> to vector<1x8x128xf32>
    %145 = vector.shape_cast %144 : vector<1x8x128xf32> to vector<8x128xf32>
    %cst_41 = arith.constant dense<0.000000e+00> : vector<8x128xf32>
    %146 = tpu.matmul %140, %2, %cst_41 {dimension_numbers = #tpu.dot_dimension_numbers<[1], [0], [0], [1], [0, 0, 1, 1], [], []>} : vector<8x32xf32>, vector<32x128xf32>, vector<8x128xf32> -> vector<8x128xf32>
    %147 = arith.addf %145, %146 : vector<8x128xf32>
    %148 = arith.negf %147 : vector<8x128xf32>
    %149 = math.exp %148 : vector<8x128xf32>
    %cst_42 = arith.constant 1.000000e+00 : f32
    %150 = vector.broadcast %cst_42 : f32 to vector<8x128xf32>
    %151 = arith.addf %150, %149 : vector<8x128xf32>
    %152 = arith.divf %150, %151 : vector<8x128xf32>
    %153 = vector.extract_strided_slice %152 {offsets = [0, 0], sizes = [8, 32], strides = [1, 1]} : vector<8x128xf32> to vector<8x32xf32>
    %154 = vector.extract_strided_slice %152 {offsets = [0, 32], sizes = [8, 32], strides = [1, 1]} : vector<8x128xf32> to vector<8x32xf32>
    %155 = vector.extract_strided_slice %152 {offsets = [0, 96], sizes = [8, 32], strides = [1, 1]} : vector<8x128xf32> to vector<8x32xf32>
    %156 = vector.extract_strided_slice %147 {offsets = [0, 64], sizes = [8, 32], strides = [1, 1]} : vector<8x128xf32> to vector<8x32xf32>
    %157 = math.tanh %156 : vector<8x32xf32>
    %158 = arith.mulf %154, %138 : vector<8x32xf32>
    %159 = arith.mulf %153, %157 : vector<8x32xf32>
    %160 = arith.addf %158, %159 : vector<8x32xf32>
    %161 = math.tanh %160 : vector<8x32xf32>
    %162 = arith.mulf %155, %161 : vector<8x32xf32>
    %c6 = arith.constant 6 : index
    %c0_43 = arith.constant 0 : index
    %c0_44 = arith.constant 0 : index
    %163 = vector.load %arg10[%c6, %c0_43, %c0_44] : memref<8x8x32xf32, #tpu.memory_space<vmem>>, vector<1x8x32xf32>
    %164 = vector.shape_cast %163 : vector<1x8x32xf32> to vector<8x32xf32>
    %165 = vector.shape_cast %162 : vector<8x32xf32> to vector<1x8x32xf32>
    tpu.vector_store %arg10[%c6, %c0_43, %c0_44], %165 {strides = array<i32>} : memref<8x8x32xf32, #tpu.memory_space<vmem>>, vector<1x8x32xf32>,
    %166 = vector.extract_strided_slice %12 {offsets = [7, 0, 0], sizes = [1, 8, 128], strides = [1, 1, 1]} : vector<8x8x128xf32> to vector<1x8x128xf32>
    %167 = vector.shape_cast %166 : vector<1x8x128xf32> to vector<8x128xf32>
    %cst_45 = arith.constant dense<0.000000e+00> : vector<8x128xf32>
    %168 = tpu.matmul %162, %2, %cst_45 {dimension_numbers = #tpu.dot_dimension_numbers<[1], [0], [0], [1], [0, 0, 1, 1], [], []>} : vector<8x32xf32>, vector<32x128xf32>, vector<8x128xf32> -> vector<8x128xf32>
    %169 = arith.addf %167, %168 : vector<8x128xf32>
    %170 = arith.negf %169 : vector<8x128xf32>
    %171 = math.exp %170 : vector<8x128xf32>
    %cst_46 = arith.constant 1.000000e+00 : f32
    %172 = vector.broadcast %cst_46 : f32 to vector<8x128xf32>
    %173 = arith.addf %172, %171 : vector<8x128xf32>
    %174 = arith.divf %172, %173 : vector<8x128xf32>
    %175 = vector.extract_strided_slice %174 {offsets = [0, 0], sizes = [8, 32], strides = [1, 1]} : vector<8x128xf32> to vector<8x32xf32>
    %176 = vector.extract_strided_slice %174 {offsets = [0, 32], sizes = [8, 32], strides = [1, 1]} : vector<8x128xf32> to vector<8x32xf32>
    %177 = vector.extract_strided_slice %174 {offsets = [0, 96], sizes = [8, 32], strides = [1, 1]} : vector<8x128xf32> to vector<8x32xf32>
    %178 = vector.extract_strided_slice %169 {offsets = [0, 64], sizes = [8, 32], strides = [1, 1]} : vector<8x128xf32> to vector<8x32xf32>
    %179 = math.tanh %178 : vector<8x32xf32>
    %180 = arith.mulf %176, %160 : vector<8x32xf32>
    %181 = arith.mulf %175, %179 : vector<8x32xf32>
    %182 = arith.addf %180, %181 : vector<8x32xf32>
    %183 = math.tanh %182 : vector<8x32xf32>
    %184 = arith.mulf %177, %183 : vector<8x32xf32>
    %c7 = arith.constant 7 : index
    %c0_47 = arith.constant 0 : index
    %c0_48 = arith.constant 0 : index
    %185 = vector.load %arg10[%c7, %c0_47, %c0_48] : memref<8x8x32xf32, #tpu.memory_space<vmem>>, vector<1x8x32xf32>
    %186 = vector.shape_cast %185 : vector<1x8x32xf32> to vector<8x32xf32>
    %187 = vector.shape_cast %184 : vector<8x32xf32> to vector<1x8x32xf32>
    tpu.vector_store %arg10[%c7, %c0_47, %c0_48], %187 {strides = array<i32>} : memref<8x8x32xf32, #tpu.memory_space<vmem>>, vector<1x8x32xf32>,
    %c0_49 = arith.constant 0 : index
    %c0_50 = arith.constant 0 : index
    %c0_51 = arith.constant 0 : index
    %188 = vector.load %arg10[%c0_49, %c0_50, %c0_51] : memref<8x8x32xf32, #tpu.memory_space<vmem>>, vector<8x8x32xf32>
    %189 = tpu.transpose %188, [1, 0, 2] : vector<8x8x32xf32> -> vector<8x8x32xf32>
    %190 = vector.shape_cast %189 : vector<8x8x32xf32> to vector<64x32xf32>
    %cst_52 = arith.constant dense<0.000000e+00> : vector<64x32xf32>
    %191 = tpu.matmul %190, %4, %cst_52 {dimension_numbers = #tpu.dot_dimension_numbers<[1], [0], [0], [1], [0, 0, 1, 1], [], []>} : vector<64x32xf32>, vector<32x32xf32>, vector<64x32xf32> -> vector<64x32xf32>
    %192 = vector.shape_cast %191 : vector<64x32xf32> to vector<8x8x32xf32>
    "tpu.trace_start"() <{level = 10 : i32, message = "bsk,btk->bst"}> : () -> ()
    %cst_53 = arith.constant dense<0.000000e+00> : vector<8x8x8xf32>
    %193 = tpu.matmul %192, %189, %cst_53 {dimension_numbers = #tpu.dot_dimension_numbers<[2], [2], [1], [1], [0, 0, 0, 1, 1, 1], [0], [0]>} : vector<8x8x32xf32>, vector<8x8x32xf32>, vector<8x8x8xf32> -> vector<8x8x8xf32>
    "tpu.trace_stop"() : () -> ()
    %cst_54 = arith.constant dense<0xFF800000> : vector<8x8xf32>
    %194 = vector.multi_reduction <maximumf>, %193, %cst_54 [2] : vector<8x8x8xf32> to vector<8x8xf32>
    %195 = vector.shape_cast %194 : vector<8x8xf32> to vector<8x8x1xf32>
    %196 = vector.broadcast %195 : vector<8x8x1xf32> to vector<8x8x8xf32>
    %197 = arith.subf %193, %196 : vector<8x8x8xf32>
    %198 = math.exp %197 : vector<8x8x8xf32>
    %cst_55 = arith.constant dense<0.000000e+00> : vector<8x8xf32>
    %199 = vector.multi_reduction <add>, %198, %cst_55 [2] : vector<8x8x8xf32> to vector<8x8xf32>
    %200 = vector.shape_cast %199 : vector<8x8xf32> to vector<8x8x1xf32>
    %201 = tpu.reciprocal %200 : vector<8x8x1xf32> -> vector<8x8x1xf32>
    %202 = vector.broadcast %201 : vector<8x8x1xf32> to vector<8x8x8xf32>
    %203 = arith.mulf %198, %202 : vector<8x8x8xf32>
    %cst_56 = arith.constant dense<0.000000e+00> : vector<8x8xf32>
    %204 = vector.multi_reduction <add>, %203, %cst_56 [1] : vector<8x8x8xf32> to vector<8x8xf32>
    %cst_57 = arith.constant 1.250000e-01 : f32
    %205 = vector.broadcast %cst_57 : f32 to vector<8x8xf32>
    %206 = arith.mulf %204, %205 : vector<8x8xf32>
    %207 = vector.shape_cast %206 : vector<8x8xf32> to vector<8x1x8xf32>
    "tpu.trace_start"() <{level = 10 : i32, message = "bqt,bth->bqh"}> : () -> ()
    %cst_58 = arith.constant dense<0.000000e+00> : vector<8x1x32xf32>
    %208 = tpu.matmul %207, %189, %cst_58 {dimension_numbers = #tpu.dot_dimension_numbers<[2], [1], [1], [2], [0, 0, 0, 1, 1, 2], [0], [0]>} : vector<8x1x8xf32>, vector<8x8x32xf32>, vector<8x1x32xf32> -> vector<8x1x32xf32>
    "tpu.trace_stop"() : () -> ()
    %209 = vector.shape_cast %208 : vector<8x1x32xf32> to vector<8x32xf32>
    %210 = vector.extract_strided_slice %5 {offsets = [0, 0], sizes = [32, 128], strides = [1, 1]} : vector<36x128xf32> to vector<32x128xf32>
    %211 = vector.extract_strided_slice %5 {offsets = [32, 0], sizes = [4, 128], strides = [1, 1]} : vector<36x128xf32> to vector<4x128xf32>
    %cst_59 = arith.constant dense<0.000000e+00> : vector<8x128xf32>
    %212 = tpu.matmul %209, %210, %cst_59 {dimension_numbers = #tpu.dot_dimension_numbers<[1], [0], [0], [1], [0, 0, 1, 1], [], []>} : vector<8x32xf32>, vector<32x128xf32>, vector<8x128xf32> -> vector<8x128xf32>
    %cst_60 = arith.constant dense<0.000000e+00> : vector<8x128xf32>
    %213 = tpu.matmul %7, %211, %cst_60 {dimension_numbers = #tpu.dot_dimension_numbers<[1], [0], [0], [1], [0, 0, 1, 1], [], []>} : vector<8x4xf32>, vector<4x128xf32>, vector<8x128xf32> -> vector<8x128xf32>
    %214 = arith.addf %212, %213 : vector<8x128xf32>
    %215 = vector.broadcast %6 : vector<1x128xf32> to vector<8x128xf32>
    %216 = arith.addf %214, %215 : vector<8x128xf32>
    %c0_61 = arith.constant 0 : index
    %c0_62 = arith.constant 0 : index
    %217 = vector.load %arg9[%c0_61, %c0_62] : memref<8x128xf32, #tpu.memory_space<vmem>>, vector<8x128xf32>
    tpu.vector_store %arg9[%c0_61, %c0_62], %216 {strides = array<i32>} : memref<8x128xf32, #tpu.memory_space<vmem>>, vector<8x128xf32>,
    return
  }
  func.func @transform_0(%arg0: i32) -> (i32, i32, i32) {
    %c0_i32 = arith.constant 0 : i32
    %c0_i32_0 = arith.constant 0 : i32
    %c0_i32_1 = arith.constant 0 : i32
    return %c0_i32, %arg0, %c0_i32_0 : i32, i32, i32
  }
  func.func @transform_1(%arg0: i32) -> (i32, i32) {
    %c0_i32 = arith.constant 0 : i32
    %c0_i32_0 = arith.constant 0 : i32
    %c0_i32_1 = arith.constant 0 : i32
    return %c0_i32, %c0_i32_0 : i32, i32
  }
  func.func @transform_2(%arg0: i32) -> (i32, i32) {
    %c0_i32 = arith.constant 0 : i32
    %c0_i32_0 = arith.constant 0 : i32
    %c0_i32_1 = arith.constant 0 : i32
    return %c0_i32, %c0_i32_0 : i32, i32
  }
  func.func @transform_3(%arg0: i32) -> (i32, i32) {
    %c0_i32 = arith.constant 0 : i32
    %c0_i32_0 = arith.constant 0 : i32
    %c0_i32_1 = arith.constant 0 : i32
    return %c0_i32, %c0_i32_0 : i32, i32
  }
  func.func @transform_4(%arg0: i32) -> (i32, i32) {
    %c0_i32 = arith.constant 0 : i32
    %c0_i32_0 = arith.constant 0 : i32
    %c0_i32_1 = arith.constant 0 : i32
    return %c0_i32, %c0_i32_0 : i32, i32
  }
  func.func @transform_5(%arg0: i32) -> (i32, i32) {
    %c0_i32 = arith.constant 0 : i32
    %c0_i32_0 = arith.constant 0 : i32
    %c0_i32_1 = arith.constant 0 : i32
    return %c0_i32, %c0_i32_0 : i32, i32
  }
  func.func @transform_6(%arg0: i32) -> (i32, i32) {
    %c0_i32 = arith.constant 0 : i32
    %c0_i32_0 = arith.constant 0 : i32
    %c0_i32_1 = arith.constant 0 : i32
    return %c0_i32, %c0_i32_0 : i32, i32
  }
  func.func @transform_7(%arg0: i32) -> (i32, i32) {
    %c0_i32 = arith.constant 0 : i32
    %c0_i32_0 = arith.constant 0 : i32
    return %arg0, %c0_i32 : i32, i32
  }
  func.func @transform_8(%arg0: i32) -> (i32, i32) {
    %c0_i32 = arith.constant 0 : i32
    %c0_i32_0 = arith.constant 0 : i32
    return %arg0, %c0_i32 : i32, i32
  }
}

</mosaic_0001>

<bundles_post_ra>
// kernel: tpu_custom_call.1
= control target key start
LH: loop header
LB: loop body
LE: loop exit
PB: predicated region body
PF: predicated region fallthrough
CT: control target
= control target key end

     0   :  { %13 = vsyncpa [#allocation4], 0  ;;  %s2224_s0 = inlined_call_operand.hbm [shape: f32[8,8,17], index: 0, kind: input, shape index: {}]   ;;  %s2225_s1 = inlined_call_operand.hbm [shape: f32[17,128], index: 1, kind: input, shape index: {}]   ;;  %s2226_s2 = inlined_call_operand.hbm [shape: f32[32,128], index: 2, kind: input, shape index: {}]   ;;  %s2227_s3 = inlined_call_operand.vmem [shape: f32[1,128], index: 3, kind: input, shape index: {}]   ;;  %s2228_s4 = inlined_call_operand.hbm [shape: f32[32,32], index: 4, kind: input, shape index: {}]   ;;  %s2229_s5 = inlined_call_operand.hbm [shape: f32[36,128], index: 5, kind: input, shape index: {}]   ;;  %s2230_s6 = inlined_call_operand.vmem [shape: f32[1,128], index: 6, kind: input, shape index: {}]   ;;  %s2231_s7 = inlined_call_operand.vmem [shape: f32[8,4], index: 7, kind: input, shape index: {}]   ;;  %s2232_s8 = inlined_call_operand.hbm [shape: f32[8,128], index: 8, kind: output, shape index: {}]  }
   0x1   :  { %14 = vsyncpa [#allocation7], 0 }
   0x2   :  { %15 = vsyncpa [#allocation10], 0 }
   0x3   :  { %16 = vsyncpa [#allocation5], 0  ;;  %s34_s29 = sshll.u32 %s2225_s1, 4  ;;  %s1948_s30 = smov [#allocation6]   ;;  %s35_s29 = int_to_ptr.hbm [resolvable:$true] %s34_s29 }
   0x4   :  { %s36_s9 = sshll.u32 %s1948_s30, 4  ;;  %s62_s12 = sshll.u32 %s2228_s4, 4  ;;  %s37_s9 = int_to_ptr.vmem [resolvable:$true] %s36_s9  ;;  %s63_s12 = int_to_ptr.hbm [resolvable:$true] %s62_s12 }
   0x5   :  { %s1949_s13 = smov 128   ;;  %s1950_s14 = smov 8  }
   0x6   :  { %42 = dma.hbm_to_vmem [thread:$0]  %s35_s29, 384, %s37_s9, [#allocation7], %s1949_s13, %s1949_s13, %s1950_s14  }
   0x7   :  { %s1951_s15 = smov [#allocation9]   ;;  %s21_s19 = sshll.u32 %s2224_s0, 4  ;;  %s22_s19 = int_to_ptr.hbm [resolvable:$true] %s21_s19 }
   0x8   :  { %s64_s16 = sshll.u32 %s1951_s15, 4  ;;  %s47_s21 = sshll.u32 %s2226_s2, 4  ;;  %s65_s16 = int_to_ptr.vmem [resolvable:$true] %s64_s16  ;;  %s48_s21 = int_to_ptr.hbm [resolvable:$true] %s47_s21 }
   0x9   :  { %70 = dma.hbm_to_vmem [thread:$0]  %s63_s12, 512, %s65_s16, [#allocation10], %s1949_s13, %s1949_s13, %s1950_s14  }
   0xa   :  { %s1952_s22 = smov [#allocation3]   ;;  %s1953_s4 = smov [#allocation8]  }
   0xb   :  { %s23_s23 = sshll.u32 %s1952_s22, 4  ;;  %s49_s24 = sshll.u32 %s1953_s4, 4  ;;  %s24_s23 = int_to_ptr.vmem [resolvable:$true] %s23_s23  ;;  %s50_s24 = int_to_ptr.vmem [resolvable:$true] %s49_s24 }
   0xc   :  { %29 = dma.hbm_to_vmem [thread:$0]  %s22_s19, 1024, %s24_s23, [#allocation4], %s1949_s13, %s1949_s13, %s1950_s14  }
   0xd   :  { %s75_s27 = sshll.u32 %s2229_s5, 4  ;;  %s1954_s0 = smov [#allocation11]   ;;  %s76_s27 = int_to_ptr.hbm [resolvable:$true] %s75_s27 }
   0xe   :  { %55 = dma.hbm_to_vmem [thread:$0]  %s48_s21, 512, %s50_s24, [#allocation7], %s1949_s13, %s1949_s13, %s1950_s14  }
   0xf   :  { %s77_s28 = sshll.u32 %s1954_s0, 4  ;;  %s78_s28 = int_to_ptr.vmem [resolvable:$true] %s77_s28 }
  0x10   :  { %83 = dma.hbm_to_vmem [thread:$0]  %s76_s27, 640, %s78_s28, [#allocation10], %s1949_s13, %s1949_s13, %s1950_s14  }
  0x11   :  { %1940 = dma.done.wait [#allocation4], 1024  }
  0x12   :  { %1941 = vsyncadd [#allocation4], 4294966272 }
  0x13   :  { %1942 = dma.done.wait [#allocation7], 896  }
  0x14   :  { %1943 = vsyncadd [#allocation7], 4294966400 }
  0x15   :  { %1944 = dma.done.wait [#allocation10], 1152  }
  0x16   :  { %1945 = vsyncadd [#allocation10], 4294966144  ;;  %vm163_vm0 = vcmask 1040384   ;;  %v118_v0 = vld [vmem:[#allocation6 + $0x10] sm:$0x1]  ;;  %v117_v1 = vld [vmem:[#allocation6 + $0x8] sm:$0xff] }
  0x17   :  { %1627 = vmatpush.msk.msra.mxu0 %vm163_vm0, %v118_v0  ;;  %v116_v2 = vld [vmem:[#allocation6] sm:$0xff]  ;;  %vm138_vm1 = vcmask 138240   ;;  %s1955_s29 = smov 64   ;;  %v122_v27 = vld [vmem:[#allocation8 + $0x18] sm:$0xff]  ;;  %v121_v28 = vld [vmem:[#allocation8 + $0x10] sm:$0xff]  ;;  %vm249_vm6 = vcmask 261120  }
  0x18   :  { %v108_v3 = vld [vmem:[#allocation3] sm:$0xff]  ;;  %265 = vmatpush.msra.mxu1 %v122_v27  ;;  %v109_v29 = vld [vmem:[#allocation3 + $0x8] sm:$0xff]  ;;  %331 = vmatpush.msra.mxu2 %v122_v27  ;;  %v119_v31 = vld [vmem:[#allocation8] sm:$0xff]  ;;  %s1959_s11 = smov [#allocation12]   ;;  %s1615_s15 = sshll.u32 %s2232_s8, 4  ;;  %s1616_s15 = int_to_ptr.hbm [resolvable:$true] %s1615_s15 }
  0x19   :  { %181 = vmatpush.msra.mxu0 %v117_v1  ;;  %v2024_v4 = vld [vmem:[%s2227_s3] ss:$0 sm:$0xff]  ;;  %s1956_s3 = smov 32   ;;  %397 = vmatpush.msra.mxu3 %v122_v27  ;;  %v110_v61 = vld [vmem:[#allocation3 + $0x10] sm:$0xff]  ;;  %s1613_s12 = sshll.u32 %s1959_s11, 4  ;;  %s1614_s12 = int_to_ptr.vmem [resolvable:$true] %s1613_s12 }
  0x1a   :  { %v120_v30 = vld [vmem:[#allocation8 + $0x8] sm:$0xff]  ;;  %266 = vmatpush.msra.mxu1 %v121_v28  ;;  %332 = vmatpush.msra.mxu2 %v121_v28 }
  0x1b   :  { %182 = vmatpush.msra.mxu0 %v116_v2  ;;  %398 = vmatpush.msra.mxu3 %v121_v28 }
  0x1c   :  { %1628 = vmatmul.msk.f32.vlgmr.msra.gmra.mxu0 %vm138_vm1, %v108_v3  ;;  %267 = vmatpush.msra.mxu1 %v120_v30 }
  0x1d   :  { %333 = vmatpush.msra.mxu2 %v120_v30  ;;  %399 = vmatpush.msra.mxu3 %v120_v30 }
  0x1e   :  { %268 = vmatpush.msra.mxu1 %v119_v31 }
  0x1f   :  { %334 = vmatpush.msra.mxu2 %v119_v31  ;;  %400 = vmatpush.msra.mxu3 %v119_v31 }
  0x20   :  { %463 = vmatpush.msrb.mxu1 %v122_v27 }
  0x21   :  { %529 = vmatpush.msrb.mxu2 %v122_v27  ;;  %595 = vmatpush.msrb.mxu3 %v122_v27 }
  0x22   :  { %464 = vmatpush.msrb.mxu1 %v121_v28 }
  0x23   :  { %530 = vmatpush.msrb.mxu2 %v121_v28  ;;  %596 = vmatpush.msrb.mxu3 %v121_v28 }
  0x24   :  { %1629 = vmatmul.msk.f32.gmra.mxu0 %vm138_vm1, %v109_v29  ;;  %465 = vmatpush.msrb.mxu1 %v120_v30 }
  0x25   :  { %531 = vmatpush.msrb.mxu2 %v120_v30  ;;  %597 = vmatpush.msrb.mxu3 %v120_v30 }
  0x26   :  { %466 = vmatpush.msrb.mxu1 %v119_v31 }
  0x27   :  { %532 = vmatpush.msrb.mxu2 %v119_v31  ;;  %598 = vmatpush.msrb.mxu3 %v119_v31 }
  0x2c   :  { %1630 = vmatmul.msk.f32.gmra.mxu0 %vm138_vm1, %v110_v61 }
  0x99   :  { %v184_v5 = vpop.f32.mrf.mxu0 }
  0x9a   :  { %v185_v6 = vadd.f32 %v2024_v4, %v184_v5 }
  0x9c   :  { %1700 = vtanh.f32 %v185_v6  ;;  %v1636_v8 = vmul.f32 -1.442695, %v185_v6 }
  0x9e   :  { %1702 = vpow2.f32 %v1636_v8 }
  0xa1   :  { %v187_v35 = vpop.f32.mrf.mxu0 }
  0xa2   :  { %v1701_v7 = vpop.eup %1700  ;;  %v188_v36 = vadd.f32 %v2024_v4, %v187_v35 }
  0xa3   :  { %230 = vrot.lane.b32.xlu0 %v1701_v7, %s1955_s29 }
  0xa4   :  { %v1703_v9 = vpop.eup %1702 }
  0xa5   :  { %v211_v10 = vadd.f32 1.0, %v1703_v9 }
  0xa7   :  { %1704 = vrcp.f32 %v211_v10  ;;  %v223_v16 = vand.u32 2147483648, %v211_v10  ;;  %vm217_vm3 = vweird.f32 %v211_v10  ;;  %v221_v17 = vand.u32 2147483647, %v211_v10 }
  0xa9   :  { %v224_v19 = vor.u32 1.1754944e-38, %v223_v16  ;;  %vm222_vm5 = vcmp.eq.f32.partialorder %v221_v17, 8.507059e+37  ;;  %v190_v63 = vpop.f32.mrf.mxu0 }
  0xaa   :  { %v191_v0 = vadd.f32 %v2024_v4, %v190_v63 }
  0xad   :  { %v1705_v11 = vpop.eup %1704 }
  0xae   :  { %v213_v12 = vmul.f32 %v1705_v11, %v211_v10  ;;  %vm218_vm2 = vweird.f32 %v1705_v11 }
  0xaf   :  { %vm219_vm4 = vmor %vm217_vm3, %vm218_vm2 }
  0xb0   :  { %v214_v13 = vsub.f32 1.0, %v213_v12 }
  0xb2   :  { %v215_v14 = vmul.f32 %v1705_v11, %v214_v13 }
  0xb4   :  { %v216_v15 = vadd.f32 %v1705_v11, %v215_v14 }
  0xb6   :  { %v220_v18 = vsel %vm219_vm4, %v1705_v11, %v216_v15 }
  0xb7   :  { %v225_v21 = vsel %vm222_vm5, %v224_v19, %v220_v18 }
  0xb8   :  { %v228_v23 = vmul.f32 0.0, %v225_v21 }
 0x115   :  { %v231_v20 = vpop.permute.xlu0 %230 }
 0x116   :  { %v233_v22 = vmul.f32 %v231_v20, %v225_v21 }
 0x118   :  { %235 = vrot.lane.b32.xlu0 %v233_v22, %s1956_s3 }
 0x18a   :  { %v236_v24 = vpop.permute.xlu0 %235 }
 0x18b   :  { %v2029_v25 = vadd.f32 %v236_v24, %v228_v23 }
 0x18d   :  { %1706 = vtanh.f32 %v2029_v25 }
 0x193   :  { %v1707_v26 = vpop.eup %1706 }
 0x194   :  { %241 = vrot.lane.b32.xlu1 %v1707_v26, %s1955_s29  ;;  %v111_v26 = vld [vmem:[#allocation3 + $0x18] sm:$0xff] }
 0x195   :  { %1631 = vmatmul.msk.f32.gmra.mxu0 %vm138_vm1, %v111_v26 }
 0x206   :  { %v242_v32 = vpop.permute.xlu1 %241 }
 0x207   :  { %v244_v33 = vmul.f32 %v242_v32, %v225_v21 }
 0x209   :  { %246 = vrot.lane.b32.xlu1 %v244_v33, %s1956_s3 }
 0x27b   :  { %v247_v34 = vpop.permute.xlu1 %246 }
 0x27c   :  { %250 = vst.msk [vmem:[#allocation2] sm:$0xff] %vm249_vm6, %v247_v34  ;;  %1637 = vmatmul.msk.f32.vlgmr.msra.gmra.mxu1 %vm249_vm6, %v247_v34 }
 0x27d   :  { %661 = vmatpush.msra.mxu1 %v122_v27 }
 0x27f   :  { %662 = vmatpush.msra.mxu1 %v121_v28  ;;  %v193_v28 = vpop.f32.mrf.mxu0 }
 0x280   :  { %v194_v29 = vadd.f32 %v2024_v4, %v193_v28 }
 0x281   :  { %663 = vmatpush.msra.mxu1 %v120_v30 }
 0x283   :  { %664 = vmatpush.msra.mxu1 %v119_v31 }
 0x2f9   :  { %v270_v37 = vpop.f32.mrf.mxu1 }
 0x2fa   :  { %v273_v38 = vadd.f32 %v270_v37, %v188_v36 }
 0x2fc   :  { %1708 = vtanh.f32 %v273_v38  ;;  %v1638_v40 = vmul.f32 -1.442695, %v273_v38 }
 0x2fe   :  { %1710 = vpow2.f32 %v1638_v40 }
 0x302   :  { %v1709_v39 = vpop.eup %1708 }
 0x303   :  { %296 = vrot.lane.b32.xlu2 %v1709_v39, %s1955_s29 }
 0x304   :  { %v1711_v41 = vpop.eup %1710 }
 0x305   :  { %v277_v42 = vadd.f32 1.0, %v1711_v41 }
 0x307   :  { %1712 = vrcp.f32 %v277_v42  ;;  %v289_v48 = vand.u32 2147483648, %v277_v42  ;;  %vm283_vm8 = vweird.f32 %v277_v42  ;;  %v287_v49 = vand.u32 2147483647, %v277_v42 }
 0x309   :  { %v290_v51 = vor.u32 1.1754944e-38, %v289_v48  ;;  %vm288_vm10 = vcmp.eq.f32.partialorder %v287_v49, 8.507059e+37 }
 0x30d   :  { %v1713_v43 = vpop.eup %1712 }
 0x30e   :  { %v279_v44 = vmul.f32 %v1713_v43, %v277_v42  ;;  %vm284_vm7 = vweird.f32 %v1713_v43 }
 0x30f   :  { %vm285_vm9 = vmor %vm283_vm8, %vm284_vm7 }
 0x310   :  { %v280_v45 = vsub.f32 1.0, %v279_v44 }
 0x312   :  { %v281_v46 = vmul.f32 %v1713_v43, %v280_v45 }
 0x314   :  { %v282_v47 = vadd.f32 %v1713_v43, %v281_v46 }
 0x316   :  { %v286_v50 = vsel %vm285_vm9, %v1713_v43, %v282_v47 }
 0x317   :  { %v291_v53 = vsel %vm288_vm10, %v290_v51, %v286_v50 }
 0x318   :  { %v294_v55 = vmul.f32 %v291_v53, %v2029_v25 }
 0x35d   :  { %v297_v52 = vpop.permute.xlu2 %296 }
 0x35e   :  { %v299_v54 = vmul.f32 %v297_v52, %v291_v53  ;;  %v112_v52 = vld [vmem:[#allocation3 + $0x20] sm:$0xff] }
 0x35f   :  { %1632 = vmatmul.msk.f32.gmra.mxu0 %vm138_vm1, %v112_v52 }
 0x360   :  { %301 = vrot.lane.b32.xlu2 %v299_v54, %s1956_s3 }
 0x3ba   :  { %v302_v56 = vpop.permute.xlu2 %301 }
 0x3bb   :  { %v304_v57 = vadd.f32 %v302_v56, %v294_v55 }
 0x3bd   :  { %1714 = vtanh.f32 %v304_v57 }
 0x3c3   :  { %v1715_v58 = vpop.eup %1714 }
 0x3c4   :  { %307 = vrot.lane.b32.xlu0 %v1715_v58, %s1955_s29 }
 0x3dc   :  { %v196_v56 = vpop.f32.mrf.mxu0 }
 0x436   :  { %v308_v59 = vpop.permute.xlu0 %307 }
 0x437   :  { %v310_v60 = vmul.f32 %v308_v59, %v291_v53 }
 0x439   :  { %312 = vrot.lane.b32.xlu1 %v310_v60, %s1956_s3 }
 0x4ab   :  { %v313_v62 = vpop.permute.xlu1 %312 }
 0x4ac   :  { %316 = vst.msk [vmem:[#allocation2 + $0x8] sm:$0xff] %vm249_vm6, %v313_v62  ;;  %1639 = vmatmul.msk.f32.vlgmr.msra.gmra.mxu2 %vm249_vm6, %v313_v62 }
 0x52f   :  { %v336_v1 = vpop.f32.mrf.mxu2 }
 0x530   :  { %v339_v2 = vadd.f32 %v336_v1, %v191_v0 }
 0x532   :  { %1716 = vtanh.f32 %v339_v2  ;;  %v1640_v5 = vmul.f32 -1.442695, %v339_v2 }
 0x534   :  { %1718 = vpow2.f32 %v1640_v5 }
 0x538   :  { %v1717_v3 = vpop.eup %1716 }
 0x539   :  { %362 = vrot.lane.b32.xlu2 %v1717_v3, %s1955_s29 }
 0x53a   :  { %v1719_v6 = vpop.eup %1718 }
 0x53b   :  { %v343_v7 = vadd.f32 1.0, %v1719_v6 }
 0x53d   :  { %1720 = vrcp.f32 %v343_v7  ;;  %v355_v13 = vand.u32 2147483648, %v343_v7  ;;  %vm349_vm12 = vweird.f32 %v343_v7  ;;  %v353_v14 = vand.u32 2147483647, %v343_v7 }
 0x53f   :  { %v356_v16 = vor.u32 1.1754944e-38, %v355_v13  ;;  %vm354_vm14 = vcmp.eq.f32.partialorder %v353_v14, 8.507059e+37 }
 0x543   :  { %v1721_v8 = vpop.eup %1720 }
 0x544   :  { %v345_v9 = vmul.f32 %v1721_v8, %v343_v7  ;;  %vm350_vm11 = vweird.f32 %v1721_v8 }
 0x545   :  { %vm351_vm13 = vmor %vm349_vm12, %vm350_vm11 }
 0x546   :  { %v346_v10 = vsub.f32 1.0, %v345_v9 }
 0x548   :  { %v347_v11 = vmul.f32 %v1721_v8, %v346_v10 }
 0x54a   :  { %v348_v12 = vadd.f32 %v1721_v8, %v347_v11 }
 0x54c   :  { %v352_v15 = vsel %vm351_vm13, %v1721_v8, %v348_v12 }
 0x54d   :  { %v357_v18 = vsel %vm354_vm14, %v356_v16, %v352_v15 }
 0x54e   :  { %v360_v20 = vmul.f32 %v357_v18, %v304_v57  ;;  %v197_v57 = vadd.f32 %v2024_v4, %v196_v56 }
 0x593   :  { %v363_v17 = vpop.permute.xlu2 %362 }
 0x594   :  { %v365_v19 = vmul.f32 %v363_v17, %v357_v18 }
 0x596   :  { %367 = vrot.lane.b32.xlu0 %v365_v19, %s1956_s3  ;;  %v113_v19 = vld [vmem:[#allocation3 + $0x28] sm:$0xff] }
 0x597   :  { %1633 = vmatmul.msk.f32.gmra.mxu0 %vm138_vm1, %v113_v19 }
 0x608   :  { %v368_v21 = vpop.permute.xlu0 %367 }
 0x609   :  { %v370_v22 = vadd.f32 %v368_v21, %v360_v20 }
 0x60b   :  { %1722 = vtanh.f32 %v370_v22 }
 0x611   :  { %v1723_v23 = vpop.eup %1722 }
 0x612   :  { %373 = vrot.lane.b32.xlu1 %v1723_v23, %s1955_s29 }
 0x614   :  { %v199_v21 = vpop.f32.mrf.mxu0 }
 0x684   :  { %v374_v24 = vpop.permute.xlu1 %373 }
 0x685   :  { %v376_v25 = vmul.f32 %v374_v24, %v357_v18 }
 0x687   :  { %378 = vrot.lane.b32.xlu2 %v376_v25, %s1956_s3 }
 0x6e1   :  { %v379_v27 = vpop.permute.xlu2 %378 }
 0x6e2   :  { %382 = vst.msk [vmem:[#allocation2 + $0x10] sm:$0xff] %vm249_vm6, %v379_v27  ;;  %1641 = vmatmul.msk.f32.vlgmr.msra.gmra.mxu3 %vm249_vm6, %v379_v27 }
 0x765   :  { %v402_v30 = vpop.f32.mrf.mxu3 }
 0x766   :  { %v405_v31 = vadd.f32 %v402_v30, %v194_v29 }
 0x768   :  { %1724 = vtanh.f32 %v405_v31  ;;  %v1642_v33 = vmul.f32 -1.442695, %v405_v31 }
 0x76a   :  { %1726 = vpow2.f32 %v1642_v33 }
 0x76e   :  { %v1725_v32 = vpop.eup %1724 }
 0x76f   :  { %428 = vrot.lane.b32.xlu0 %v1725_v32, %s1955_s29 }
 0x770   :  { %v1727_v34 = vpop.eup %1726 }
 0x771   :  { %v409_v35 = vadd.f32 1.0, %v1727_v34 }
 0x773   :  { %1728 = vrcp.f32 %v409_v35  ;;  %v421_v41 = vand.u32 2147483648, %v409_v35  ;;  %vm415_vm0 = vweird.f32 %v409_v35  ;;  %v419_v42 = vand.u32 2147483647, %v409_v35 }
 0x775   :  { %v422_v44 = vor.u32 1.1754944e-38, %v421_v41  ;;  %vm420_vm3 = vcmp.eq.f32.partialorder %v419_v42, 8.507059e+37 }
 0x779   :  { %v1729_v36 = vpop.eup %1728 }
 0x77a   :  { %v411_v37 = vmul.f32 %v1729_v36, %v409_v35  ;;  %vm416_vm15 = vweird.f32 %v1729_v36 }
 0x77b   :  { %vm417_vm2 = vmor %vm415_vm0, %vm416_vm15 }
 0x77c   :  { %v412_v38 = vsub.f32 1.0, %v411_v37 }
 0x77e   :  { %v413_v39 = vmul.f32 %v1729_v36, %v412_v38 }
 0x780   :  { %v414_v40 = vadd.f32 %v1729_v36, %v413_v39 }
 0x782   :  { %v418_v43 = vsel %vm417_vm2, %v1729_v36, %v414_v40 }
 0x783   :  { %v423_v46 = vsel %vm420_vm3, %v422_v44, %v418_v43 }
 0x784   :  { %v426_v48 = vmul.f32 %v423_v46, %v370_v22  ;;  %v200_v22 = vadd.f32 %v2024_v4, %v199_v21 }
 0x7e1   :  { %v429_v45 = vpop.permute.xlu0 %428 }
 0x7e2   :  { %v431_v47 = vmul.f32 %v429_v45, %v423_v46 }
 0x7e4   :  { %433 = vrot.lane.b32.xlu1 %v431_v47, %s1956_s3  ;;  %v114_v47 = vld [vmem:[#allocation3 + $0x30] sm:$0xff] }
 0x7e5   :  { %1634 = vmatmul.msk.f32.gmra.mxu0 %vm138_vm1, %v114_v47  ;;  %v1957_v47 = vmov 1983009808  }
 0x856   :  { %v434_v49 = vpop.permute.xlu1 %433 }
 0x857   :  { %v436_v50 = vadd.f32 %v434_v49, %v426_v48 }
 0x859   :  { %1730 = vtanh.f32 %v436_v50 }
 0x85f   :  { %v1731_v51 = vpop.eup %1730 }
 0x860   :  { %439 = vrot.lane.b32.xlu2 %v1731_v51, %s1955_s29 }
 0x862   :  { %v202_v49 = vpop.f32.mrf.mxu0 }
 0x8ba   :  { %v440_v53 = vpop.permute.xlu2 %439 }
 0x8bb   :  { %v442_v54 = vmul.f32 %v440_v53, %v423_v46 }
 0x8bd   :  { %444 = vrot.lane.b32.xlu0 %v442_v54, %s1956_s3 }
 0x92f   :  { %v445_v55 = vpop.permute.xlu0 %444 }
 0x930   :  { %448 = vst.msk [vmem:[#allocation2 + $0x18] sm:$0xff] %vm249_vm6, %v445_v55  ;;  %1643 = vmatmul.msk.f32.vlgmr.msrb.gmra.mxu1 %vm249_vm6, %v445_v55 }
 0x9ad   :  { %v468_v58 = vpop.f32.mrf.mxu1 }
 0x9ae   :  { %v471_v59 = vadd.f32 %v468_v58, %v197_v57 }
 0x9b0   :  { %1732 = vtanh.f32 %v471_v59  ;;  %v1644_v61 = vmul.f32 -1.442695, %v471_v59 }
 0x9b2   :  { %1734 = vpow2.f32 %v1644_v61 }
 0x9b6   :  { %v1733_v60 = vpop.eup %1732 }
 0x9b7   :  { %494 = vrot.lane.b32.xlu1 %v1733_v60, %s1955_s29 }
 0x9b8   :  { %v1735_v62 = vpop.eup %1734 }
 0x9b9   :  { %v475_v63 = vadd.f32 1.0, %v1735_v62 }
 0x9bb   :  { %1736 = vrcp.f32 %v475_v63  ;;  %v487_v6 = vand.u32 2147483648, %v475_v63  ;;  %vm481_vm5 = vweird.f32 %v475_v63  ;;  %v485_v7 = vand.u32 2147483647, %v475_v63 }
 0x9bd   :  { %v488_v9 = vor.u32 1.1754944e-38, %v487_v6  ;;  %vm486_vm8 = vcmp.eq.f32.partialorder %v485_v7, 8.507059e+37 }
 0x9c1   :  { %v1737_v0 = vpop.eup %1736 }
 0x9c2   :  { %v477_v1 = vmul.f32 %v1737_v0, %v475_v63  ;;  %vm482_vm4 = vweird.f32 %v1737_v0 }
 0x9c3   :  { %vm483_vm7 = vmor %vm481_vm5, %vm482_vm4  ;;  %vm722_vm5 = vcmask 1047556  }
 0x9c4   :  { %v478_v2 = vsub.f32 1.0, %v477_v1 }
 0x9c6   :  { %v479_v3 = vmul.f32 %v1737_v0, %v478_v2 }
 0x9c8   :  { %v480_v5 = vadd.f32 %v1737_v0, %v479_v3 }
 0x9ca   :  { %v484_v8 = vsel %vm483_vm7, %v1737_v0, %v480_v5  ;;  %vm1083_vm7 = vcmask 64512  }
 0x9cb   :  { %v489_v11 = vsel %vm486_vm8, %v488_v9, %v484_v8 }
 0x9cc   :  { %v492_v13 = vmul.f32 %v489_v11, %v436_v50  ;;  %v203_v50 = vadd.f32 %v2024_v4, %v202_v49  ;;  %v713_v49 = vld [vmem:[#allocation2] sm:$0xff] }
 0xa29   :  { %v495_v10 = vpop.permute.xlu1 %494 }
 0xa2a   :  { %v497_v12 = vmul.f32 %v495_v10, %v489_v11  ;;  %v115_v10 = vld [vmem:[#allocation3 + $0x38] sm:$0xff] }
 0xa2b   :  { %1635 = vmatmul.msk.f32.gmra.mxu0 %vm138_vm1, %v115_v10 }
 0xa2c   :  { %499 = vrot.lane.b32.xlu2 %v497_v12, %s1956_s3 }
 0xa86   :  { %v500_v14 = vpop.permute.xlu2 %499 }
 0xa87   :  { %v502_v15 = vadd.f32 %v500_v14, %v492_v13 }
 0xa89   :  { %1738 = vtanh.f32 %v502_v15 }
 0xa8f   :  { %v1739_v16 = vpop.eup %1738 }
 0xa90   :  { %505 = vrot.lane.b32.xlu0 %v1739_v16, %s1955_s29 }
 0xaa8   :  { %v205_v14 = vpop.f32.mrf.mxu0 }
 0xb02   :  { %v506_v17 = vpop.permute.xlu0 %505 }
 0xb03   :  { %v508_v18 = vmul.f32 %v506_v17, %v489_v11 }
 0xb05   :  { %510 = vrot.lane.b32.xlu1 %v508_v18, %s1956_s3 }
 0xb77   :  { %v511_v20 = vpop.permute.xlu1 %510 }
 0xb78   :  { %514 = vst.msk [vmem:[#allocation2 + $0x20] sm:$0xff] %vm249_vm6, %v511_v20  ;;  %1645 = vmatmul.msk.f32.vlgmr.msrb.gmra.mxu2 %vm249_vm6, %v511_v20 }
 0xbfb   :  { %v534_v23 = vpop.f32.mrf.mxu2 }
 0xbfc   :  { %v537_v24 = vadd.f32 %v534_v23, %v200_v22 }
 0xbfe   :  { %1740 = vtanh.f32 %v537_v24  ;;  %v1646_v26 = vmul.f32 -1.442695, %v537_v24 }
 0xc00   :  { %1742 = vpow2.f32 %v1646_v26 }
 0xc04   :  { %v1741_v25 = vpop.eup %1740 }
 0xc05   :  { %560 = vrot.lane.b32.xlu2 %v1741_v25, %s1955_s29 }
 0xc06   :  { %v1743_v27 = vpop.eup %1742 }
 0xc07   :  { %v541_v28 = vadd.f32 1.0, %v1743_v27 }
 0xc09   :  { %1744 = vrcp.f32 %v541_v28  ;;  %v553_v34 = vand.u32 2147483648, %v541_v28  ;;  %vm547_vm10 = vweird.f32 %v541_v28  ;;  %v551_v35 = vand.u32 2147483647, %v541_v28 }
 0xc0b   :  { %v554_v37 = vor.u32 1.1754944e-38, %v553_v34  ;;  %vm552_vm12 = vcmp.eq.f32.partialorder %v551_v35, 8.507059e+37 }
 0xc0f   :  { %v1745_v29 = vpop.eup %1744 }
 0xc10   :  { %v543_v30 = vmul.f32 %v1745_v29, %v541_v28  ;;  %vm548_vm9 = vweird.f32 %v1745_v29 }
 0xc11   :  { %vm549_vm11 = vmor %vm547_vm10, %vm548_vm9 }
 0xc12   :  { %v544_v31 = vsub.f32 1.0, %v543_v30 }
 0xc14   :  { %v545_v32 = vmul.f32 %v1745_v29, %v544_v31 }
 0xc16   :  { %v546_v33 = vadd.f32 %v1745_v29, %v545_v32 }
 0xc18   :  { %v550_v36 = vsel %vm549_vm11, %v1745_v29, %v546_v33 }
 0xc19   :  { %v555_v39 = vsel %vm552_vm12, %v554_v37, %v550_v36 }
 0xc1a   :  { %v558_v41 = vmul.f32 %v555_v39, %v502_v15  ;;  %v206_v15 = vadd.f32 %v2024_v4, %v205_v14 }
 0xc5f   :  { %v561_v38 = vpop.permute.xlu2 %560 }
 0xc60   :  { %v563_v40 = vmul.f32 %v561_v38, %v555_v39 }
 0xc62   :  { %565 = vrot.lane.b32.xlu0 %v563_v40, %s1956_s3  ;;  %v126_v40 = vld [vmem:[#allocation9 + $0x10] sm:$0xff] }
 0xcd4   :  { %v566_v42 = vpop.permute.xlu0 %565 }
 0xcd5   :  { %v568_v43 = vadd.f32 %v566_v42, %v558_v41  ;;  %v125_v41 = vld [vmem:[#allocation9 + $0x8] sm:$0xff]  ;;  %v124_v42 = vld [vmem:[#allocation9] sm:$0xff] }
 0xcd7   :  { %1746 = vtanh.f32 %v568_v43 }
 0xcdd   :  { %v1747_v44 = vpop.eup %1746 }
 0xcde   :  { %571 = vrot.lane.b32.xlu1 %v1747_v44, %s1955_s29  ;;  %v716_v44 = vld [vmem:[#allocation2 + $0x18] sm:$0xff] }
 0xd50   :  { %v572_v45 = vpop.permute.xlu1 %571 }
 0xd51   :  { %v574_v46 = vmul.f32 %v572_v45, %v555_v39  ;;  %v127_v39 = vld [vmem:[#allocation9 + $0x18] sm:$0xff] }
 0xd52   :  { %870 = vmatpush.msra.mxu2 %v127_v39 }
 0xd53   :  { %576 = vrot.lane.b32.xlu2 %v574_v46, %s1956_s3  ;;  %v734_v46 = vrot.slane %v716_v44, 4 }
 0xd54   :  { %871 = vmatpush.msra.mxu2 %v126_v40 }
 0xd56   :  { %872 = vmatpush.msra.mxu2 %v125_v41 }
 0xd58   :  { %873 = vmatpush.msra.mxu2 %v124_v42 }
 0xdad   :  { %v577_v48 = vpop.permute.xlu2 %576 }
 0xdae   :  { %580 = vst.msk [vmem:[#allocation2 + $0x28] sm:$0xff] %vm249_vm6, %v577_v48  ;;  %1647 = vmatmul.msk.f32.vlgmr.msrb.gmra.mxu3 %vm249_vm6, %v577_v48  ;;  %v727_v48 = vunpack.c.l.s4 %v1957_v47 }
 0xe31   :  { %v600_v51 = vpop.f32.mrf.mxu3 }
 0xe32   :  { %v603_v52 = vadd.f32 %v600_v51, %v203_v50  ;;  %v714_v50 = vld [vmem:[#allocation2 + $0x8] sm:$0xff]  ;;  %v717_v51 = vld [vmem:[#allocation2 + $0x20] sm:$0xff] }
 0xe34   :  { %1748 = vtanh.f32 %v603_v52  ;;  %v1648_v54 = vmul.f32 -1.442695, %v603_v52 }
 0xe36   :  { %1750 = vpow2.f32 %v1648_v54  ;;  %v735_v54 = vsel %vm722_vm5, %v734_v46, %v714_v50 }
 0xe3a   :  { %v1749_v53 = vpop.eup %1748 }
 0xe3b   :  { %626 = vrot.lane.b32.xlu0 %v1749_v53, %s1955_s29 }
 0xe3c   :  { %v1751_v55 = vpop.eup %1750 }
 0xe3d   :  { %v607_v56 = vadd.f32 1.0, %v1751_v55 }
 0xe3f   :  { %1752 = vrcp.f32 %v607_v56  ;;  %v619_v62 = vand.u32 2147483648, %v607_v56  ;;  %vm613_vm14 = vweird.f32 %v607_v56  ;;  %v617_v63 = vand.u32 2147483647, %v607_v56 }
 0xe41   :  { %v620_v1 = vor.u32 1.1754944e-38, %v619_v62  ;;  %vm618_vm0 = vcmp.eq.f32.partialorder %v617_v63, 8.507059e+37  ;;  %v736_v62 = vrot.slane %v714_v50, 4 }
 0xe45   :  { %v1753_v57 = vpop.eup %1752 }
 0xe46   :  { %v609_v58 = vmul.f32 %v1753_v57, %v607_v56  ;;  %vm614_vm13 = vweird.f32 %v1753_v57  ;;  %v728_v56 = vunpack.c.0.s8 %v727_v48 }
 0xe47   :  { %vm615_vm15 = vmor %vm613_vm14, %vm614_vm13 }
 0xe48   :  { %v610_v59 = vsub.f32 1.0, %v609_v58 }
 0xe4a   :  { %v611_v60 = vmul.f32 %v1753_v57, %v610_v59  ;;  %v748_v59 = vrot.slane %v717_v51, 4 }
 0xe4c   :  { %v612_v61 = vadd.f32 %v1753_v57, %v611_v60 }
 0xe4e   :  { %v616_v0 = vsel %vm615_vm15, %v1753_v57, %v612_v61  ;;  %v724_v57 = vrot.slane %v713_v49, 4  ;;  %v741_v61 = vperm.slane %v735_v54, %v728_v56 }
 0xe4f   :  { %v621_v3 = vsel %vm618_vm0, %v620_v1, %v616_v0  ;;  %v718_v1 = vld [vmem:[#allocation2 + $0x28] sm:$0xff] }
 0xe50   :  { %v624_v6 = vmul.f32 %v621_v3, %v568_v43  ;;  %v715_v43 = vld [vmem:[#allocation2 + $0x10] sm:$0xff] }
 0xe51   :  { %v721_v45 = vrot.slane %v715_v43, 4  ;;  %v725_v63 = vsel %vm722_vm5, %v715_v43, %v724_v57 }
 0xe53   :  { %v723_v53 = vsel %vm722_vm5, %v721_v45, %v713_v49 }
 0xe54   :  { %v729_v60 = vperm.slane %v723_v53, %v728_v56 }
 0xead   :  { %v627_v2 = vpop.permute.xlu0 %626 }
 0xeae   :  { %v629_v5 = vmul.f32 %v627_v2, %v621_v3 }
 0xeb0   :  { %631 = vrot.lane.b32.xlu1 %v629_v5, %s1956_s3 }
 0xf22   :  { %v632_v7 = vpop.permute.xlu1 %631 }
 0xf23   :  { %v634_v8 = vadd.f32 %v632_v7, %v624_v6  ;;  %v737_v6 = vsel %vm722_vm5, %v716_v44, %v736_v62  ;;  %v770_v7 = vrot.slane %v741_v61, 4 }
 0xf25   :  { %1754 = vtanh.f32 %v634_v8 }
 0xf2b   :  { %v1755_v9 = vpop.eup %1754 }
 0xf2c   :  { %637 = vrot.lane.b32.xlu2 %v1755_v9, %s1955_s29  ;;  %v733_v9 = vperm.slane %v725_v63, %v728_v56 }
 0xf86   :  { %v638_v11 = vpop.permute.xlu2 %637 }
 0xf87   :  { %v640_v12 = vmul.f32 %v638_v11, %v621_v3  ;;  %v1958_v3 = vmov 1934713408   ;;  %v760_v11 = vrot.slane %v718_v1, 4 }
 0xf88   :  { %v775_v5 = vunpack.c.l.s4 %v1958_v3 }
 0xf89   :  { %642 = vrot.lane.b32.xlu0 %v640_v12, %s1956_s3 }
 0xffb   :  { %v643_v13 = vpop.permute.xlu0 %642 }
 0xffc   :  { %646 = vst.msk [vmem:[#allocation2 + $0x30] sm:$0xff] %vm249_vm6, %v643_v13  ;;  %1649 = vmatmul.msk.f32.vlgmr.msra.gmra.mxu1 %vm249_vm6, %v643_v13 }
0x1003   :  { %v719_v52 = vld [vmem:[#allocation2 + $0x30] sm:$0xff] }
0x1004   :  { %v746_v58 = vrot.slane %v719_v52, 4  ;;  %v749_v0 = vsel %vm722_vm5, %v719_v52, %v748_v59 }
0x1005   :  { %v757_v10 = vperm.slane %v749_v0, %v728_v56 }
0x1006   :  { %v747_v2 = vsel %vm722_vm5, %v746_v58, %v717_v51 }
0x1007   :  { %v753_v13 = vperm.slane %v747_v2, %v728_v56 }
0x1079   :  { %v666_v16 = vpop.f32.mrf.mxu1 }
0x107a   :  { %v669_v17 = vadd.f32 %v666_v16, %v206_v15  ;;  %v745_v15 = vperm.slane %v737_v6, %v728_v56 }
0x107c   :  { %1756 = vtanh.f32 %v669_v17  ;;  %v1650_v19 = vmul.f32 -1.442695, %v669_v17  ;;  %v776_v17 = vunpack.c.0.s8 %v775_v5  ;;  %v782_v48 = vrot.slane %v745_v15, 4 }
0x107e   :  { %1758 = vpow2.f32 %v1650_v19  ;;  %v783_v50 = vsel %vm722_vm5, %v782_v48, %v733_v9 }
0x107f   :  { %v789_v52 = vperm.slane %v783_v50, %v776_v17 }
0x1081   :  { %v828_v54 = vrot.slane %v789_v52, 4 }
0x1082   :  { %v1757_v18 = vpop.eup %1756 }
0x1083   :  { %692 = vrot.lane.b32.xlu1 %v1757_v18, %s1955_s29 }
0x1084   :  { %v1759_v20 = vpop.eup %1758 }
0x1085   :  { %v673_v21 = vadd.f32 1.0, %v1759_v20  ;;  %v784_v20 = vrot.slane %v733_v9, 4 }
0x1087   :  { %1760 = vrcp.f32 %v673_v21  ;;  %v685_v27 = vand.u32 2147483648, %v673_v21  ;;  %vm679_vm2 = vweird.f32 %v673_v21  ;;  %v683_v4 = vand.u32 2147483647, %v673_v21 }
0x1089   :  { %v686_v29 = vor.u32 1.1754944e-38, %v685_v27  ;;  %vm684_vm4 = vcmp.eq.f32.partialorder %v683_v4, 8.507059e+37  ;;  %v785_v27 = vsel %vm722_vm5, %v745_v15, %v784_v20 }
0x108d   :  { %v1761_v22 = vpop.eup %1760 }
0x108e   :  { %v675_v23 = vmul.f32 %v1761_v22, %v673_v21  ;;  %vm680_vm1 = vweird.f32 %v1761_v22  ;;  %v808_v21 = vrot.slane %v757_v10, 4 }
0x108f   :  { %vm681_vm3 = vmor %vm679_vm2, %vm680_vm1 }
0x1090   :  { %v676_v24 = vsub.f32 1.0, %v675_v23 }
0x1092   :  { %v677_v25 = vmul.f32 %v1761_v22, %v676_v24 }
0x1094   :  { %v678_v26 = vadd.f32 %v1761_v22, %v677_v25 }
0x1096   :  { %v682_v28 = vsel %vm681_vm3, %v1761_v22, %v678_v26  ;;  %v771_v22 = vsel %vm722_vm5, %v770_v7, %v729_v60  ;;  %v796_v26 = vrot.slane %v753_v13, 4 }
0x1097   :  { %v687_v31 = vsel %vm684_vm4, %v686_v29, %v682_v28  ;;  %v777_v29 = vperm.slane %v771_v22, %v776_v17 }
0x1098   :  { %v690_v33 = vmul.f32 %v687_v31, %v634_v8  ;;  %v772_v8 = vrot.slane %v729_v60, 4 }
0x1099   :  { %v820_v40 = vrot.slane %v777_v29, 4 }
0x109a   :  { %v773_v14 = vsel %vm722_vm5, %v741_v61, %v772_v8 }
0x109b   :  { %v781_v24 = vperm.slane %v773_v14, %v776_v17 }
0x10f5   :  { %v693_v30 = vpop.permute.xlu1 %692 }
0x10f6   :  { %v695_v32 = vmul.f32 %v693_v30, %v687_v31 }
0x10f8   :  { %697 = vrot.lane.b32.xlu2 %v695_v32, %s1956_s3 }
0x1152   :  { %v698_v34 = vpop.permute.xlu2 %697 }
0x1153   :  { %v700_v35 = vadd.f32 %v698_v34, %v690_v33  ;;  %v824_v33 = vrot.slane %v781_v24, 4  ;;  %v793_v34 = vperm.slane %v785_v27, %v776_v17 }
0x1155   :  { %1762 = vtanh.f32 %v700_v35 }
0x115b   :  { %v1763_v36 = vpop.eup %1762 }
0x115c   :  { %703 = vrot.lane.b32.xlu0 %v1763_v36, %s1955_s29 }
0x11ce   :  { %v704_v37 = vpop.permute.xlu0 %703 }
0x11cf   :  { %v706_v38 = vmul.f32 %v704_v37, %v687_v31 }
0x11d1   :  { %708 = vrot.lane.b32.xlu1 %v706_v38, %s1956_s3 }
0x1243   :  { %v709_v55 = vpop.permute.xlu1 %708 }
0x1244   :  { %712 = vst.msk [vmem:[#allocation2 + $0x38] sm:$0xff] %vm249_vm6, %v709_v55 }
0x124b   :  { %v720_v12 = vld [vmem:[#allocation2 + $0x38] sm:$0xff] }
0x124c   :  { %v758_v16 = vrot.slane %v720_v12, 4  ;;  %v761_v18 = vsel %vm722_vm5, %v720_v12, %v760_v11 }
0x124d   :  { %v769_v19 = vperm.slane %v761_v18, %v728_v56 }
0x124e   :  { %v759_v23 = vsel %vm722_vm5, %v758_v16, %v718_v1 }
0x124f   :  { %v765_v25 = vperm.slane %v759_v23, %v728_v56  ;;  %v809_v4 = vsel %vm722_vm5, %v769_v19, %v808_v21  ;;  %v806_v46 = vrot.slane %v769_v19, 4  ;;  %v832_v56 = vrot.slane %v793_v34, 4 }
0x1250   :  { %v817_v28 = vperm.slane %v809_v4, %v776_v17 }
0x1251   :  { %v794_v30 = vrot.slane %v765_v25, 4  ;;  %v797_v31 = vsel %vm722_vm5, %v765_v25, %v796_v26  ;;  %v807_v47 = vsel %vm722_vm5, %v806_v46, %v757_v10 }
0x1252   :  { %v805_v32 = vperm.slane %v797_v31, %v776_v17  ;;  %v830_v35 = vrot.slane %v817_v28, 4  ;;  %v813_v49 = vperm.slane %v807_v47, %v776_v17  ;;  %v2130_v57 = vsel %vm722_vm5, %v817_v28, %v832_v56 }
0x1253   :  { %v795_v36 = vsel %vm722_vm5, %v794_v30, %v753_v13 }
0x1254   :  { %v825_v37 = vsel %vm722_vm5, %v805_v32, %v824_v33  ;;  %v831_v38 = vsel %vm722_vm5, %v830_v35, %v793_v34  ;;  %v801_v39 = vperm.slane %v795_v36, %v776_v17  ;;  %v822_v41 = vrot.slane %v805_v32, 4 }
0x1255   :  { %1427 = vmatpush.msrb.mxu0 %v825_v37  ;;  %v826_v51 = vrot.slane %v813_v49, 4  ;;  %v2124_v55 = vsel %vm722_vm5, %v813_v49, %v828_v54 }
0x1256   :  { %v821_v42 = vsel %vm722_vm5, %v801_v39, %v820_v40  ;;  %v818_v43 = vrot.slane %v801_v39, 4  ;;  %v823_v45 = vsel %vm722_vm5, %v822_v41, %v781_v24 }
0x1257   :  { %1496 = vmatpush.msra.mxu0 %v831_v38  ;;  %1661 = vmatpush.xpose.msk.msrb.mxu1 %vm249_vm6, %v821_v42  ;;  %v827_v53 = vsel %vm722_vm5, %v826_v51, %v789_v52 }
0x1258   :  { %v819_v44 = vsel %vm722_vm5, %v818_v43, %v777_v29 }
0x1259   :  { %1651 = vmatmul.msk.f32.vlgmr.msra.gmra.mxu2 %vm249_vm6, %v819_v44  ;;  %1659 = vmatpush.xpose.msk.msra.mxu3 %vm249_vm6, %v819_v44 }
0x125b   :  { %1665 = vmatpush.xpose.msk.msra.mxu1 %vm249_vm6, %v825_v37 }
0x125d   :  { %1663 = vmatpush.xpose.msk.msrb.mxu3 %vm249_vm6, %v823_v45 }
0x1261   :  { %1652 = vmatmul.msk.f32.gmra.mxu2 %vm249_vm6, %v821_v42 }
0x1269   :  { %1653 = vmatmul.msk.f32.gmra.mxu2 %vm249_vm6, %v823_v45 }
0x1271   :  { %1654 = vmatmul.msk.f32.gmra.mxu2 %vm249_vm6, %v825_v37 }
0x1279   :  { %1655 = vmatmul.msk.f32.gmra.mxu2 %vm249_vm6, %v827_v53 }
0x1281   :  { %1656 = vmatmul.msk.f32.gmra.mxu2 %vm249_vm6, %v2124_v55 }
0x1289   :  { %1657 = vmatmul.msk.f32.gmra.mxu2 %vm249_vm6, %v831_v38 }
0x1291   :  { %1658 = vmatmul.msk.f32.gmra.mxu2 %vm249_vm6, %v2130_v57 }
0x12dc   :  { %v875_v58 = vpop.f32.mrf.mxu2 }
0x12dd   :  { %1660 = vmatmul.msk.f32.vlgmr.msra.gmra.mxu3 %vm249_vm6, %v875_v58 }
0x12de   :  { %1667 = vmatpush.xpose.msk.msra.mxu3 %vm249_vm6, %v827_v53 }
0x12e4   :  { %v878_v59 = vpop.f32.mrf.mxu2 }
0x12e5   :  { %1662 = vmatmul.msk.f32.vlgmr.msrb.gmra.mxu1 %vm249_vm6, %v878_v59 }
0x12e6   :  { %1669 = vmatpush.xpose.msk.msrb.mxu1 %vm249_vm6, %v2124_v55 }
0x12ec   :  { %v881_v60 = vpop.f32.mrf.mxu2 }
0x12ed   :  { %1664 = vmatmul.msk.f32.vlgmr.msrb.gmra.mxu3 %vm249_vm6, %v881_v60 }
0x12ee   :  { %1671 = vmatpush.xpose.msk.msrb.mxu3 %vm249_vm6, %v831_v38 }
0x12f4   :  { %v884_v61 = vpop.f32.mrf.mxu2 }
0x12f5   :  { %1666 = vmatmul.msk.f32.vlgmr.msra.gmra.mxu1 %vm249_vm6, %v884_v61 }
0x12f6   :  { %1673 = vmatpush.xpose.msk.msra.mxu1 %vm249_vm6, %v2130_v57 }
0x12fc   :  { %v887_v62 = vpop.f32.mrf.mxu2 }
0x12fd   :  { %1668 = vmatmul.msk.f32.vlgmr.msra.gmra.mxu3 %vm249_vm6, %v887_v62 }
0x12fe   :  { %1358 = vmatpush.msra.mxu3 %v819_v44 }
0x1304   :  { %v890_v63 = vpop.f32.mrf.mxu2 }
0x1305   :  { %1670 = vmatmul.msk.f32.vlgmr.msrb.gmra.mxu1 %vm249_vm6, %v890_v63 }
0x1306   :  { %1381 = vmatpush.msrb.mxu1 %v821_v42 }
0x130c   :  { %v893_v0 = vpop.f32.mrf.mxu2 }
0x130d   :  { %1672 = vmatmul.msk.f32.vlgmr.msrb.gmra.mxu3 %vm249_vm6, %v893_v0 }
0x130e   :  { %1404 = vmatpush.msrb.mxu3 %v823_v45 }
0x1314   :  { %v896_v1 = vpop.f32.mrf.mxu2 }
0x1315   :  { %1674 = vmatmul.msk.f32.vlgmr.msra.gmra.mxu1 %vm249_vm6, %v896_v1 }
0x1316   :  { %1450 = vmatpush.msra.mxu1 %v827_v53 }
0x1360   :  { %v919_v2 = vpop.f32.mrf.mxu3 }
0x1361   :  { %v1084_v3 = vsel %vm1083_vm7, %v919_v2, -inf }
0x1362   :  { %1085 = vmax.xlane.f32.xlu2 %v1084_v3  ;;  %v942_v5 = vpop.f32.mrf.mxu1 }
0x1363   :  { %v1087_v6 = vsel %vm1083_vm7, %v942_v5, -inf }
0x1364   :  { %1088 = vmax.xlane.f32.xlu0 %v1087_v6 }
0x1370   :  { %v965_v7 = vpop.f32.mrf.mxu3 }
0x1371   :  { %v1090_v8 = vsel %vm1083_vm7, %v965_v7, -inf }
0x1372   :  { %1091 = vmax.xlane.f32.xlu1 %v1090_v8  ;;  %v988_v9 = vpop.f32.mrf.mxu1 }
0x1373   :  { %v1093_v10 = vsel %vm1083_vm7, %v988_v9, -inf }
0x1374   :  { %1094 = vmax.xlane.f32.xlu2 %v1093_v10 }
0x1380   :  { %v1011_v11 = vpop.f32.mrf.mxu3 }
0x1381   :  { %v1096_v12 = vsel %vm1083_vm7, %v1011_v11, -inf }
0x1382   :  { %1097 = vmax.xlane.f32.xlu2 %v1096_v12  ;;  %v1034_v13 = vpop.f32.mrf.mxu1 }
0x1383   :  { %v1099_v14 = vsel %vm1083_vm7, %v1034_v13, -inf }
0x1384   :  { %1100 = vmax.xlane.f32.xlu0 %v1099_v14 }
0x1390   :  { %v1057_v15 = vpop.f32.mrf.mxu3 }
0x1391   :  { %v1102_v16 = vsel %vm1083_vm7, %v1057_v15, -inf }
0x1392   :  { %1103 = vmax.xlane.f32.xlu1 %v1102_v16  ;;  %v1080_v17 = vpop.f32.mrf.mxu1 }
0x1393   :  { %v1105_v18 = vsel %vm1083_vm7, %v1080_v17, -inf }
0x1394   :  { %1106 = vmax.xlane.f32.xlu2 %v1105_v18 }
0x13d5   :  { %v1086_v19 = vpop.xlane.xlu2 %1085 }
0x13d6   :  { %v1108_v20 = vsub.f32 %v919_v2, %v1086_v19 }
0x13d7   :  { %v1089_v21 = vpop.xlane.xlu0 %1088 }
0x13d8   :  { %v1116_v22 = vmul.f32 1.442695, %v1108_v20  ;;  %v1109_v23 = vsub.f32 %v942_v5, %v1089_v21 }
0x13da   :  { %1764 = vpow2.f32 %v1116_v22  ;;  %v1118_v24 = vmul.f32 1.442695, %v1109_v23 }
0x13dc   :  { %1766 = vpow2.f32 %v1118_v24 }
0x13e0   :  { %v2156_v25 = vpop.eup %1764 }
0x13e1   :  { %v1132_v26 = vsel %vm1083_vm7, %v2156_v25, 0.0 }
0x13e2   :  { %v2160_v27 = vpop.eup %1766  ;;  %1133 = vadd.xlane.f32.xlu0 %v1132_v26 }
0x13e3   :  { %v1135_v4 = vsel %vm1083_vm7, %v2160_v27, 0.0 }
0x13e4   :  { %1136 = vadd.xlane.f32.xlu1 %v1135_v4 }
0x13e5   :  { %v1092_v28 = vpop.xlane.xlu1 %1091 }
0x13e6   :  { %v1110_v29 = vsub.f32 %v965_v7, %v1092_v28 }
0x13e7   :  { %v1095_v30 = vpop.xlane.xlu2 %1094 }
0x13e8   :  { %v1120_v31 = vmul.f32 1.442695, %v1110_v29  ;;  %v1111_v32 = vsub.f32 %v988_v9, %v1095_v30 }
0x13ea   :  { %1768 = vpow2.f32 %v1120_v31  ;;  %v1122_v33 = vmul.f32 1.442695, %v1111_v32 }
0x13ec   :  { %1770 = vpow2.f32 %v1122_v33 }
0x13f0   :  { %v2164_v34 = vpop.eup %1768 }
0x13f1   :  { %v1138_v35 = vsel %vm1083_vm7, %v2164_v34, 0.0 }
0x13f2   :  { %v2168_v36 = vpop.eup %1770  ;;  %1139 = vadd.xlane.f32.xlu2 %v1138_v35 }
0x13f3   :  { %v1141_v37 = vsel %vm1083_vm7, %v2168_v36, 0.0 }
0x13f4   :  { %1142 = vadd.xlane.f32.xlu0 %v1141_v37 }
0x13f5   :  { %v1098_v38 = vpop.xlane.xlu2 %1097 }
0x13f6   :  { %v1112_v39 = vsub.f32 %v1011_v11, %v1098_v38 }
0x13f7   :  { %v1101_v40 = vpop.xlane.xlu0 %1100 }
0x13f8   :  { %v1124_v41 = vmul.f32 1.442695, %v1112_v39  ;;  %v1113_v42 = vsub.f32 %v1034_v13, %v1101_v40 }
0x13fa   :  { %1772 = vpow2.f32 %v1124_v41  ;;  %v1126_v43 = vmul.f32 1.442695, %v1113_v42 }
0x13fc   :  { %1774 = vpow2.f32 %v1126_v43 }
0x1400   :  { %v2172_v44 = vpop.eup %1772 }
0x1401   :  { %v1144_v45 = vsel %vm1083_vm7, %v2172_v44, 0.0 }
0x1402   :  { %v2176_v46 = vpop.eup %1774  ;;  %1145 = vadd.xlane.f32.xlu1 %v1144_v45 }
0x1403   :  { %v1147_v47 = vsel %vm1083_vm7, %v2176_v46, 0.0 }
0x1404   :  { %1148 = vadd.xlane.f32.xlu2 %v1147_v47 }
0x1405   :  { %v1104_v48 = vpop.xlane.xlu1 %1103 }
0x1406   :  { %v1114_v49 = vsub.f32 %v1057_v15, %v1104_v48 }
0x1407   :  { %v1107_v50 = vpop.xlane.xlu2 %1106 }
0x1408   :  { %v1128_v51 = vmul.f32 1.442695, %v1114_v49  ;;  %v1115_v52 = vsub.f32 %v1080_v17, %v1107_v50 }
0x140a   :  { %1776 = vpow2.f32 %v1128_v51  ;;  %v1130_v53 = vmul.f32 1.442695, %v1115_v52 }
0x140c   :  { %1778 = vpow2.f32 %v1130_v53 }
0x1410   :  { %v2180_v54 = vpop.eup %1776 }
0x1411   :  { %v1150_v56 = vsel %vm1083_vm7, %v2180_v54, 0.0 }
0x1412   :  { %v2184_v58 = vpop.eup %1778  ;;  %1151 = vadd.xlane.f32.xlu0 %v1150_v56 }
0x1413   :  { %v1153_v59 = vsel %vm1083_vm7, %v2184_v58, 0.0 }
0x1414   :  { %1154 = vadd.xlane.f32.xlu1 %v1153_v59 }
0x1455   :  { %v1134_v60 = vpop.xlane.xlu0 %1133 }
0x1456   :  { %1780 = vrcp.f32 %v1134_v60  ;;  %v1167_v3 = vand.u32 2147483648, %v1134_v60  ;;  %v1165_v6 = vand.u32 2147483647, %v1134_v60  ;;  %vm1161_vm9 = vweird.f32 %v1134_v60 }
0x1457   :  { %v1137_v61 = vpop.xlane.xlu1 %1136 }
0x1458   :  { %1782 = vrcp.f32 %v1137_v61  ;;  %v1181_v8 = vand.u32 2147483648, %v1137_v61  ;;  %v1179_v11 = vand.u32 2147483647, %v1137_v61  ;;  %v1168_v12 = vor.u32 1.1754944e-38, %v1167_v3 }
0x1459   :  { %vm1166_vm12 = vcmp.eq.f32.partialorder %v1165_v6, 8.507059e+37  ;;  %vm1175_vm13 = vweird.f32 %v1137_v61 }
0x145a   :  { %v1182_v17 = vor.u32 1.1754944e-38, %v1181_v8  ;;  %vm1180_vm15 = vcmp.eq.f32.partialorder %v1179_v11, 8.507059e+37 }
0x145c   :  { %v1781_v62 = vpop.eup %1780 }
0x145d   :  { %v1157_v63 = vmul.f32 %v1781_v62, %v1134_v60  ;;  %vm1162_vm8 = vweird.f32 %v1781_v62 }
0x145e   :  { %v1783_v0 = vpop.eup %1782  ;;  %vm1163_vm11 = vmor %vm1161_vm9, %vm1162_vm8 }
0x145f   :  { %v1158_v1 = vsub.f32 1.0, %v1157_v63  ;;  %v1171_v2 = vmul.f32 %v1783_v0, %v1137_v61  ;;  %vm1176_vm10 = vweird.f32 %v1783_v0 }
0x1460   :  { %vm1177_vm14 = vmor %vm1175_vm13, %vm1176_vm10 }
0x1461   :  { %v1159_v5 = vmul.f32 %v1781_v62, %v1158_v1  ;;  %v1172_v7 = vsub.f32 1.0, %v1171_v2 }
0x1463   :  { %v1160_v9 = vadd.f32 %v1781_v62, %v1159_v5  ;;  %v1173_v10 = vmul.f32 %v1783_v0, %v1172_v7 }
0x1465   :  { %v1164_v13 = vsel %vm1163_vm11, %v1781_v62, %v1160_v9  ;;  %v1174_v14 = vadd.f32 %v1783_v0, %v1173_v10  ;;  %v1140_v15 = vpop.xlane.xlu2 %1139 }
0x1466   :  { %v1169_v16 = vsel %vm1166_vm12, %v1168_v12, %v1164_v13  ;;  %1784 = vrcp.f32 %v1140_v15  ;;  %v1195_v37 = vand.u32 2147483648, %v1140_v15  ;;  %v1193_v41 = vand.u32 2147483647, %v1140_v15 }
0x1467   :  { %v1268_v18 = vmul.f32 %v2156_v25, %v1169_v16  ;;  %v1178_v19 = vsel %vm1177_vm14, %v1783_v0, %v1174_v14  ;;  %v1143_v20 = vpop.xlane.xlu0 %1142  ;;  %vm1189_vm1 = vweird.f32 %v1140_v15 }
0x1468   :  { %v1183_v21 = vsel %vm1180_vm15, %v1182_v17, %v1178_v19  ;;  %1786 = vrcp.f32 %v1143_v20  ;;  %v1207_v49 = vand.u32 2147483647, %v1143_v20  ;;  %v1196_v50 = vor.u32 1.1754944e-38, %v1195_v37 }
0x1469   :  { %v1276_v22 = vsel %vm1083_vm7, %v1268_v18, 0.0  ;;  %v1269_v23 = vmul.f32 %v2160_v27, %v1183_v21  ;;  %v1209_v27 = vand.u32 2147483648, %v1143_v20  ;;  %vm1194_vm4 = vcmp.eq.f32.partialorder %v1193_v41, 8.507059e+37 }
0x146a   :  { %v1277_v24 = vrot.slane %v1276_v22, 4  ;;  %vm1203_vm5 = vweird.f32 %v1143_v20  ;;  %vm1208_vm9 = vcmp.eq.f32.partialorder %v1207_v49, 8.507059e+37 }
0x146b   :  { %v1283_v26 = vsel %vm1083_vm7, %v1269_v23, 0.0  ;;  %v1210_v60 = vor.u32 1.1754944e-38, %v1209_v27 }
0x146c   :  { %v1785_v4 = vpop.eup %1784  ;;  %v1278_v28 = vadd.f32 %v1277_v24, %v1276_v22  ;;  %v1284_v29 = vrot.slane %v1283_v26, 4 }
0x146d   :  { %v1185_v30 = vmul.f32 %v1785_v4, %v1140_v15  ;;  %vm1190_vm0 = vweird.f32 %v1785_v4 }
0x146e   :  { %v1787_v31 = vpop.eup %1786  ;;  %v1285_v32 = vadd.f32 %v1284_v29, %v1283_v26  ;;  %v1279_v33 = vrot.slane %v1278_v28, 2  ;;  %vm1191_vm3 = vmor %vm1189_vm1, %vm1190_vm0 }
0x146f   :  { %v1186_v25 = vsub.f32 1.0, %v1185_v30  ;;  %v1199_v35 = vmul.f32 %v1787_v31, %v1143_v20  ;;  %vm1204_vm2 = vweird.f32 %v1787_v31 }
0x1470   :  { %v1280_v38 = vadd.f32 %v1279_v33, %v1278_v28  ;;  %v1286_v39 = vrot.slane %v1285_v32, 2  ;;  %vm1205_vm8 = vmor %vm1203_vm5, %vm1204_vm2 }
0x1471   :  { %v1187_v40 = vmul.f32 %v1785_v4, %v1186_v25  ;;  %v1200_v42 = vsub.f32 1.0, %v1199_v35 }
0x1472   :  { %v1281_v43 = vrot.slane %v1280_v38, 1  ;;  %v1287_v45 = vadd.f32 %v1286_v39, %v1285_v32 }
0x1473   :  { %v1188_v47 = vadd.f32 %v1785_v4, %v1187_v40  ;;  %v1201_v48 = vmul.f32 %v1787_v31, %v1200_v42 }
0x1474   :  { %v1282_v51 = vadd.f32 %v1281_v43, %v1280_v38  ;;  %v1288_v61 = vrot.slane %v1287_v45, 1 }
0x1475   :  { %v1192_v52 = vsel %vm1191_vm3, %v1785_v4, %v1188_v47  ;;  %v1202_v53 = vadd.f32 %v1787_v31, %v1201_v48  ;;  %v1146_v56 = vpop.xlane.xlu1 %1145 }
0x1476   :  { %v1197_v59 = vsel %vm1194_vm4, %v1196_v50, %v1192_v52  ;;  %1788 = vrcp.f32 %v1146_v56  ;;  %v1332_v1 = vmul.f32 0.125, %v1282_v51  ;;  %v1289_v7 = vadd.f32 %v1288_v61, %v1287_v45 }
0x1477   :  { %v1270_v62 = vmul.f32 %v2164_v34, %v1197_v59  ;;  %v1206_v63 = vsel %vm1205_vm8, %v1787_v31, %v1202_v53  ;;  %v1149_v0 = vpop.xlane.xlu2 %1148  ;;  %v1223_v17 = vand.u32 2147483648, %v1146_v56  ;;  %v1221_v20 = vand.u32 2147483647, %v1146_v56 }
0x1478   :  { %v1211_v2 = vsel %vm1208_vm9, %v1210_v60, %v1206_v63  ;;  %1790 = vrcp.f32 %v1149_v0  ;;  %1675 = vmatmul.msk.f32.vlgmr.msra.gmra.mxu3 %vm1083_vm7, %v1332_v1  ;;  %v1333_v10 = vmul.f32 0.125, %v1289_v7  ;;  %vm1217_vm11 = vweird.f32 %v1146_v56 }
0x1479   :  { %v1290_v3 = vsel %vm1083_vm7, %v1270_v62, 0.0  ;;  %v1271_v5 = vmul.f32 %v2168_v36, %v1211_v2  ;;  %1473 = vmatpush.msra.mxu3 %v2124_v55  ;;  %v1237_v22 = vand.u32 2147483648, %v1149_v0  ;;  %v1235_v28 = vand.u32 2147483647, %v1149_v0 }
0x147a   :  { %v1291_v6 = vrot.slane %v1290_v3, 4  ;;  %1676 = vmatmul.msk.f32.vlgmr.msrb.gmra.mxu1 %vm1083_vm7, %v1333_v10  ;;  %v1224_v29 = vor.u32 1.1754944e-38, %v1223_v17  ;;  %vm1222_vm14 = vcmp.eq.f32.partialorder %v1221_v20, 8.507059e+37  ;;  %vm1231_vm15 = vweird.f32 %v1149_v0 }
0x147b   :  { %v1297_v8 = vsel %vm1083_vm7, %v1271_v5, 0.0  ;;  %1519 = vmatpush.msrb.mxu1 %v2130_v57  ;;  %v1238_v25 = vor.u32 1.1754944e-38, %v1237_v22  ;;  %vm1236_vm1 = vcmp.eq.f32.partialorder %v1235_v28, 8.507059e+37 }
0x147c   :  { %v1789_v9 = vpop.eup %1788  ;;  %v1292_v34 = vadd.f32 %v1291_v6, %v1290_v3  ;;  %v1298_v11 = vrot.slane %v1297_v8, 4 }
0x147d   :  { %v1213_v12 = vmul.f32 %v1789_v9, %v1146_v56  ;;  %vm1218_vm10 = vweird.f32 %v1789_v9 }
0x147e   :  { %v1791_v13 = vpop.eup %1790  ;;  %v1293_v14 = vrot.slane %v1292_v34, 2  ;;  %v1299_v15 = vadd.f32 %v1298_v11, %v1297_v8  ;;  %vm1219_vm13 = vmor %vm1217_vm11, %vm1218_vm10 }
0x147f   :  { %v1214_v16 = vsub.f32 1.0, %v1213_v12  ;;  %v1227_v36 = vmul.f32 %v1791_v13, %v1149_v0  ;;  %vm1232_vm12 = vweird.f32 %v1791_v13 }
0x1480   :  { %v1294_v18 = vadd.f32 %v1293_v14, %v1292_v34  ;;  %v1300_v55 = vrot.slane %v1299_v15, 2  ;;  %vm1233_vm0 = vmor %vm1231_vm15, %vm1232_vm12  ;;  %vm1528_vm12 = vcmask 1043456   ;;  %vm1567_vm15 = vcmask 1043459  }
0x1481   :  { %v1215_v19 = vmul.f32 %v1789_v9, %v1214_v16  ;;  %v1228_v21 = vsub.f32 1.0, %v1227_v36 }
0x1482   :  { %v1295_v23 = vrot.slane %v1294_v18, 1  ;;  %v1301_v24 = vadd.f32 %v1300_v55, %v1299_v15 }
0x1483   :  { %v1216_v26 = vadd.f32 %v1789_v9, %v1215_v19  ;;  %v1229_v4 = vmul.f32 %v1791_v13, %v1228_v21 }
0x1484   :  { %v1296_v30 = vadd.f32 %v1295_v23, %v1294_v18  ;;  %v1302_v35 = vrot.slane %v1301_v24, 1 }
0x1485   :  { %v1220_v31 = vsel %vm1219_vm13, %v1789_v9, %v1216_v26  ;;  %v1230_v57 = vadd.f32 %v1791_v13, %v1229_v4  ;;  %v1152_v32 = vpop.xlane.xlu0 %1151  ;;  %vm1524_vm13 = vcmask 31744  }
0x1486   :  { %v1225_v33 = vsel %vm1222_vm14, %v1224_v29, %v1220_v31  ;;  %1792 = vrcp.f32 %v1152_v32  ;;  %v1334_v40 = vmul.f32 0.125, %v1296_v30  ;;  %v1303_v45 = vadd.f32 %v1302_v35, %v1301_v24  ;;  %v131_v35 = vld [vmem:[#allocation11 + $0x18] sm:$0xff] }
0x1487   :  { %v1272_v37 = vmul.f32 %v2172_v44, %v1225_v33  ;;  %v1234_v38 = vsel %vm1233_vm0, %v1791_v13, %v1230_v57  ;;  %v1155_v39 = vpop.xlane.xlu1 %1154  ;;  %v1249_v0 = vand.u32 2147483647, %v1152_v32  ;;  %vm1245_vm3 = vweird.f32 %v1152_v32 }
0x1488   :  { %v1239_v41 = vsel %vm1236_vm1, %v1238_v25, %v1234_v38  ;;  %1794 = vrcp.f32 %v1155_v39  ;;  %1677 = vmatmul.msk.f32.vlgmr.msrb.gmra.mxu3 %vm1083_vm7, %v1334_v40  ;;  %v1335_v44 = vmul.f32 0.125, %v1303_v45  ;;  %v1265_v2 = vand.u32 2147483648, %v1155_v39  ;;  %v132_v25 = vld [vmem:[#allocation11 + $0x20] sm:$0xf]  ;;  %v130_v38 = vld [vmem:[#allocation11 + $0x10] sm:$0xff] }
0x1489   :  { %v1304_v42 = vsel %vm1083_vm7, %v1272_v37, 0.0  ;;  %v1273_v27 = vmul.f32 %v2176_v46, %v1239_v41  ;;  %v1251_v46 = vand.u32 2147483648, %v1152_v32  ;;  %v1263_v8 = vand.u32 2147483647, %v1155_v39  ;;  %1683 = vmatpush.msk.msrb.mxu3 %vm1528_vm12, %v132_v25  ;;  %v134_v37 = vld [vmem:[%s2231_s7] sm:$0xff]  ;;  %v128_v40 = vld [vmem:[#allocation11] sm:$0xff] }
0x148a   :  { %v1305_v43 = vrot.slane %v1304_v42, 4  ;;  %1678 = vmatmul.msk.f32.vlgmr.msrb.gmra.mxu0 %vm1083_vm7, %v1335_v44  ;;  %vm1250_vm8 = vcmp.eq.f32.partialorder %v1249_v0, 8.507059e+37  ;;  %vm1259_vm9 = vweird.f32 %v1155_v39  ;;  %v1266_v14 = vor.u32 1.1754944e-38, %v1265_v2 }
0x148b   :  { %v1311_v47 = vsel %vm1083_vm7, %v1273_v27, 0.0  ;;  %v1252_v9 = vor.u32 1.1754944e-38, %v1251_v46  ;;  %vm1264_vm11 = vcmp.eq.f32.partialorder %v1263_v8, 8.507059e+37  ;;  %1595 = vmatpush.msrb.mxu0 %v131_v35  ;;  %vm1564_vm14 = vcmask 1042434  }
0x148c   :  { %v1793_v48 = vpop.eup %1792  ;;  %v1306_v49 = vadd.f32 %v1305_v43, %v1304_v42  ;;  %v1312_v50 = vrot.slane %v1311_v47, 4  ;;  %vm1570_vm0 = vcmask 1044484   ;;  %vm1573_vm1 = vcmask 1045509  }
0x148d   :  { %v1241_v51 = vmul.f32 %v1793_v48, %v1152_v32  ;;  %vm1246_vm2 = vweird.f32 %v1793_v48  ;;  %1596 = vmatpush.msrb.mxu0 %v130_v38 }
0x148e   :  { %v1795_v52 = vpop.eup %1794  ;;  %v1313_v53 = vadd.f32 %v1312_v50, %v1311_v47  ;;  %v1307_v56 = vrot.slane %v1306_v49, 2  ;;  %vm1247_vm5 = vmor %vm1245_vm3, %vm1246_vm2  ;;  %vm1576_vm2 = vcmask 1046534   ;;  %vm1579_vm3 = vcmask 1047559  }
0x148f   :  { %v1242_v59 = vsub.f32 1.0, %v1241_v51  ;;  %v1255_v60 = vmul.f32 %v1795_v52, %v1155_v39  ;;  %vm1260_vm4 = vweird.f32 %v1795_v52  ;;  %v129_v39 = vld [vmem:[#allocation11 + $0x8] sm:$0xff] }
0x1490   :  { %v1314_v61 = vrot.slane %v1313_v53, 2  ;;  %v1308_v62 = vadd.f32 %v1307_v56, %v1306_v49  ;;  %vm1261_vm10 = vmor %vm1259_vm9, %vm1260_vm4  ;;  %1597 = vmatpush.msrb.mxu0 %v129_v39 }
0x1491   :  { %v1243_v63 = vmul.f32 %v1793_v48, %v1242_v59  ;;  %v1256_v1 = vsub.f32 1.0, %v1255_v60 }
0x1492   :  { %v1309_v3 = vrot.slane %v1308_v62, 1  ;;  %v1315_v5 = vadd.f32 %v1314_v61, %v1313_v53  ;;  %1598 = vmatpush.msrb.mxu0 %v128_v40 }
0x1493   :  { %v1244_v6 = vadd.f32 %v1793_v48, %v1243_v63  ;;  %v1257_v7 = vmul.f32 %v1795_v52, %v1256_v1 }
0x1494   :  { %v1310_v34 = vadd.f32 %v1309_v3, %v1308_v62  ;;  %v1316_v10 = vrot.slane %v1315_v5, 1  ;;  %v1699_v3 = vld [vmem:[%s2230_s6] ss:$0 sm:$0xff] }
0x1495   :  { %v1248_v11 = vsel %vm1247_vm5, %v1793_v48, %v1244_v6  ;;  %v1258_v12 = vadd.f32 %v1795_v52, %v1257_v7 }
0x1496   :  { %v1253_v13 = vsel %vm1250_vm8, %v1252_v9, %v1248_v11  ;;  %v1336_v15 = vmul.f32 0.125, %v1310_v34  ;;  %v1317_v16 = vadd.f32 %v1316_v10, %v1315_v5 }
0x1497   :  { %v1274_v36 = vmul.f32 %v2180_v54, %v1253_v13  ;;  %v1262_v17 = vsel %vm1261_vm10, %v1795_v52, %v1258_v12 }
0x1498   :  { %v1267_v18 = vsel %vm1264_vm11, %v1266_v14, %v1262_v17  ;;  %1679 = vmatmul.msk.f32.vlgmr.msra.gmra.mxu1 %vm1083_vm7, %v1336_v15  ;;  %v1337_v55 = vmul.f32 0.125, %v1317_v16 }
0x1499   :  { %v1318_v19 = vsel %vm1083_vm7, %v1274_v36, 0.0  ;;  %v1275_v20 = vmul.f32 %v2184_v58, %v1267_v18 }
0x149a   :  { %v1319_v21 = vrot.slane %v1318_v19, 4  ;;  %1680 = vmatmul.msk.f32.vlgmr.msra.gmra.mxu3 %vm1083_vm7, %v1337_v55 }
0x149b   :  { %v1325_v22 = vsel %vm1083_vm7, %v1275_v20, 0.0 }
0x149c   :  { %v1320_v23 = vadd.f32 %v1319_v21, %v1318_v19  ;;  %v1326_v24 = vrot.slane %v1325_v22, 4 }
0x149e   :  { %v1321_v26 = vrot.slane %v1320_v23, 2  ;;  %v1327_v4 = vadd.f32 %v1326_v24, %v1325_v22 }
0x14a0   :  { %v1328_v54 = vrot.slane %v1327_v4, 2  ;;  %v1322_v28 = vadd.f32 %v1321_v26, %v1320_v23 }
0x14a2   :  { %v1323_v29 = vrot.slane %v1322_v28, 1  ;;  %v1329_v30 = vadd.f32 %v1328_v54, %v1327_v4  ;;  %1684 = vmatmul.msk.f32.vlgmr.msrb.gmra.mxu3 %vm1524_vm13, %v134_v37 }
0x14a4   :  { %v1324_v31 = vadd.f32 %v1323_v29, %v1322_v28  ;;  %v1330_v57 = vrot.slane %v1329_v30, 1 }
0x14a6   :  { %v1338_v32 = vmul.f32 0.125, %v1324_v31  ;;  %v1331_v33 = vadd.f32 %v1330_v57, %v1329_v30 }
0x14a8   :  { %1681 = vmatmul.msk.f32.vlgmr.msra.gmra.mxu0 %vm1083_vm7, %v1338_v32  ;;  %v1339_v58 = vmul.f32 0.125, %v1331_v33 }
0x14aa   :  { %1682 = vmatmul.msk.f32.vlgmr.msrb.gmra.mxu1 %vm1083_vm7, %v1339_v58  ;;  %vm1561_vm7 = vcmask 1041409  }
0x14f7   :  { %v1383_v42 = vpop.f32.mrf.mxu1 }
0x14f8   :  { %v1560_v47 = vrot.slane %v1383_v42, 7 }
0x14fb   :  { %v1360_v41 = vpop.f32.mrf.mxu3 }
0x14fc   :  { %v1562_v50 = vsel %vm1561_vm7, %v1560_v47, %v1360_v41 }
0x1507   :  { %v1429_v43 = vpop.f32.mrf.mxu0 }
0x1508   :  { %v1566_v52 = vrot.slane %v1429_v43, 5 }
0x150b   :  { %v1406_v27 = vpop.f32.mrf.mxu3 }
0x150c   :  { %v1563_v45 = vrot.slane %v1406_v27, 6 }
0x150e   :  { %v1565_v44 = vsel %vm1564_vm14, %v1563_v45, %v1562_v50 }
0x150f   :  { %v1568_v56 = vsel %vm1567_vm15, %v1566_v52, %v1565_v44 }
0x1515   :  { %v1452_v48 = vpop.f32.mrf.mxu1 }
0x1516   :  { %v1569_v51 = vrot.slane %v1452_v48, 4 }
0x1518   :  { %v1571_v60 = vsel %vm1570_vm0, %v1569_v51, %v1568_v56 }
0x151d   :  { %v1475_v49 = vpop.f32.mrf.mxu3 }
0x151e   :  { %v1572_v53 = vrot.slane %v1475_v49, 3 }
0x1520   :  { %v1574_v46 = vsel %vm1573_vm1, %v1572_v53, %v1571_v60 }
0x1525   :  { %v1498_v59 = vpop.f32.mrf.mxu0  ;;  %v1549_v2 = vpop.f32.mrf.mxu3 }
0x1526   :  { %v1575_v61 = vrot.slane %v1498_v59, 2 }
0x1527   :  { %v1521_v62 = vpop.f32.mrf.mxu1 }
0x1528   :  { %v1577_v63 = vsel %vm1576_vm2, %v1575_v61, %v1574_v46  ;;  %v1578_v0 = vrot.slane %v1521_v62, 1 }
0x152a   :  { %v1580_v1 = vsel %vm1579_vm3, %v1578_v0, %v1577_v63 }
0x152b   :  { %1685 = vmatmul.msk.f32.vlgmr.msrb.gmra.mxu0 %vm249_vm6, %v1580_v1 }
0x15a8   :  { %v1600_v5 = vpop.f32.mrf.mxu0 }
0x15a9   :  { %v1601_v6 = vadd.f32 %v1600_v5, %v1549_v2 }
0x15ab   :  { %v1606_v7 = vadd.f32 %v1699_v3, %v1601_v6 }
0x15ad   :  { %1607 = vst [vmem:[#allocation12] sm:$0xff] %v1606_v7 }
0x15ae   :  { %1618 = dma.vmem_to_hbm [thread:$0]  %s1614_s12, 128, %s1616_s15, [#allocation5]  }
0x15af   :  { %1946 = dma.done.wait [#allocation5], 128  }
0x15b0   :  { %1947 = vsyncadd [#allocation5], 4294967168 }
0x15b1   :  { %1623 = vsyncpa [#allocation4], 1 }
0x15b2   :  { %1624 = vsyncpa [#allocation7], 1 }
0x15b3   :  { %1625 = vsyncpa [#allocation10], 1 }
0x15b4   :  { %1626 = vsyncpa [#allocation5], 1 }

</bundles_post_ra>
